<compile_context>
chip_gen: v7x
topology: tpu7x:2x2x1
jax: 0.10.0
libtpu: 0.0.40
codegen_flags: <defaults>
</compile_context>

<pallas_src>
import jax
import jax.numpy as jnp
from jax.experimental import pallas as pl
from jax.experimental.pallas import tpu as pltpu

LANE = 128     # TPU lane width; action dim padded up to a multiple of this.
SUBLANE = 8    # sublane quantum; batch padded up to a multiple of this.


def actor_kernel(x_ref, w1_ref, b1_ref, w2_ref, b2_ref, w3_ref, b3_ref, out_ref):
    # x tile: (TB, input_dims) f32; weights are bf16, MXU accumulates in f32.
    x = x_ref[...].astype(jnp.bfloat16)

    # fc1 + ReLU (cast back to bf16 right away: halves any spilled slab).
    h1 = jnp.dot(x, w1_ref[...], preferred_element_type=jnp.float32) + b1_ref[...]
    h1 = jnp.maximum(h1, 0.0).astype(jnp.bfloat16)

    # fc2 + ReLU
    h2 = jnp.dot(h1, w2_ref[...], preferred_element_type=jnp.float32) + b2_ref[...]
    h2 = jnp.maximum(h2, 0.0).astype(jnp.bfloat16)

    # fc3 -> logits.  Action dim is padded to a full 128-lane slab; padded
    # lanes carry a -1e30 bias (f32) so they vanish in the softmax.
    logits = jnp.dot(h2, w3_ref[...], preferred_element_type=jnp.float32) + b3_ref[...]

    # Numerically stable softmax along the lane (action) axis, all in f32.
    m = jnp.max(logits, axis=-1, keepdims=True)
    e = jnp.exp(logits - m)
    denom = jnp.sum(e, axis=-1, keepdims=True)
    # Exact reciprocal (approx=True biases every prob in a row the same way
    # and breaks sum-to-1 beyond ~1e-3).
    out_ref[...] = e * pl.reciprocal(denom, approx=False)


def actor_forward(x, params, *, block_b=None):
    """x: (B, input_dims) float32 -> (B, n_actions) action probabilities."""
    w1, b1, w2, b2, w3, b3 = params
    B, input_dims = x.shape
    fc1, fc2, n_actions = w1.shape[1], w2.shape[1], w3.shape[1]

    # --- operand prep: bf16 weights, lane-padded action dim -----------------
    w1b = w1.astype(jnp.bfloat16)
    w2b = w2.astype(jnp.bfloat16)
    n_pad = pl.cdiv(n_actions, LANE) * LANE
    w3b = jnp.pad(w3, ((0, 0), (0, n_pad - n_actions))).astype(jnp.bfloat16)
    b3p = jnp.pad(b3, ((0, 0), (0, n_pad - n_actions)),
                  constant_values=-1e30).astype(jnp.float32)
    b1f = b1.astype(jnp.float32)
    b2f = b2.astype(jnp.float32)

    # --- adaptive batch tiling ----------------------------------------------
    # Pad only to a multiple of 8 sublanes.  Small/medium batches: one grid
    # step with tb = padded_b (no wasted rows).  Large batches: 256-row tiles.
    padded_b = max(SUBLANE, pl.cdiv(B, SUBLANE) * SUBLANE)
    if block_b is None:
        tb = padded_b if padded_b <= 512 else 256
    else:
        tb = block_b
    padded_b = pl.cdiv(padded_b, tb) * tb
    if padded_b != B:
        x = jnp.pad(x, ((0, padded_b - B), (0, 0)))
    x = x.astype(jnp.float32)
    steps = padded_b // tb

    # Weights/biases stay VMEM-resident across grid steps (constant index map).
    const = lambda shape: pl.BlockSpec(shape, lambda i: (0, 0))

    flops = int(2 * padded_b * (input_dims * fc1 + fc1 * fc2 + fc2 * n_pad))
    bytes_accessed = int(
        2 * (w1b.size + w2b.size + w3b.size)          # bf16 weights
        + 4 * (b1f.size + b2f.size + b3p.size)        # f32 biases
        + 4 * x.size + 4 * padded_b * n_pad)          # f32 activations in/out

    # Short grid -> "arbitrary" (don't duplicate the dominant weight DMA on
    # both v7x TensorCores); long grid -> "parallel" for megacore sharding.
    semantics = ("parallel",) if steps >= 4 else ("arbitrary",)

    out = pl.pallas_call(
        actor_kernel,
        out_shape=jax.ShapeDtypeStruct((padded_b, n_pad), jnp.float32),
        grid=(steps,),
        in_specs=[
            pl.BlockSpec((tb, input_dims), lambda i: (i, 0)),
            const(w1b.shape), const(b1f.shape),
            const(w2b.shape), const(b2f.shape),
            const(w3b.shape), const(b3p.shape),
        ],
        out_specs=pl.BlockSpec((tb, n_pad), lambda i: (i, 0)),
        compiler_params=pltpu.CompilerParams(
            dimension_semantics=semantics),
        cost_estimate=pl.CostEstimate(
            flops=flops,
            transcendentals=int(padded_b * n_pad),
            bytes_accessed=bytes_accessed),
    )(x, w1b, b1f, w2b, b2f, w3b, b3p)

    return out[:B, :n_actions]


def init_params(key, input_dims, fc1_dims, fc2_dims, n_actions):
    """Deterministic init mimicking nn.Linear's default U(-1/sqrt(fan_in), +)."""
    ks = jax.random.split(key, 6)

    def linear(kw, kb, fan_in, fan_out):
        bound = 1.0 / jnp.sqrt(fan_in)
        # stored as (in, out) so the kernel computes x @ W
        w = jax.random.uniform(kw, (fan_in, fan_out), jnp.float32, -bound, bound)
        b = jax.random.uniform(kb, (1, fan_out), jnp.float32, -bound, bound)
        return w, b

    w1, b1 = linear(ks[0], ks[1], input_dims, fc1_dims)
    w2, b2 = linear(ks[2], ks[3], fc1_dims, fc2_dims)
    w3, b3 = linear(ks[4], ks[5], fc2_dims, n_actions)
    return (w1, b1, w2, b2, w3, b3)


def actor_reference(x, params):
    """Pure-JAX reference with matching mixed precision (bf16 in, f32 acc)."""
    w1, b1, w2, b2, w3, b3 = params
    bf = jnp.bfloat16
    h1 = jnp.maximum(jnp.dot(x.astype(bf), w1.astype(bf),
                             preferred_element_type=jnp.float32) + b1, 0.0)
    h2 = jnp.maximum(jnp.dot(h1.astype(bf), w2.astype(bf),
                             preferred_element_type=jnp.float32) + b2, 0.0)
    logits = jnp.dot(h2.astype(bf), w3.astype(bf),
                     preferred_element_type=jnp.float32) + b3
    return jax.nn.softmax(logits, axis=-1)


if __name__ == "__main__":
    # Small shapes consistent with the module (fc1=512, fc2=1024 are the
    # module defaults).  B=12 is deliberately not a multiple of 8 to exercise
    # the pad-to-sublane path (padded to 16, single grid step).
    B, INPUT_DIMS, FC1, FC2, N_ACTIONS = 12, 8, 512, 1024, 4

    key = jax.random.PRNGKey(0)
    k_params, k_x = jax.random.split(key)

    params = init_params(k_params, INPUT_DIMS, FC1, FC2, N_ACTIONS)
    x = jax.random.normal(k_x, (B, INPUT_DIMS), jnp.float32)

    probs = jax.block_until_ready(actor_forward(x, params))
    ref = actor_reference(x, params)

    assert probs.shape == (B, N_ACTIONS)
    assert jnp.allclose(probs, ref, atol=2e-3, rtol=2e-3)
    assert jnp.allclose(jnp.sum(probs, axis=-1), 1.0, atol=1e-3)
    assert bool(jnp.all(probs >= 0.0))

    # TODO(synk): Categorical(dist) sampling / log_prob and the Adam optimizer
    # are host-side wrappers, not part of the forward kernel.
    print("KERNEL_OK")
</pallas_src>

<mosaic_0001>
module attributes {stable_mosaic.version = 11 : i64} {
  func.func @actor_kernel(%arg0: i32, %arg1: memref<16x8xf32, #tpu.memory_space<vmem>>, %arg2: memref<8x512xbf16, #tpu.memory_space<vmem>>, %arg3: memref<1x512xf32, #tpu.memory_space<vmem>>, %arg4: memref<512x1024xbf16, #tpu.memory_space<vmem>>, %arg5: memref<1x1024xf32, #tpu.memory_space<vmem>>, %arg6: memref<1024x128xbf16, #tpu.memory_space<vmem>>, %arg7: memref<1x128xf32, #tpu.memory_space<vmem>>, %arg8: memref<16x128xf32, #tpu.memory_space<vmem>>) attributes {dimension_semantics = [#tpu.dimension_semantics<arbitrary>], iteration_bounds = array<i64: 1>, scalar_prefetch = 0 : i64, scratch_operands = 0 : i64, tpu.core_type = #tpu.core_type<tc>, window_params = [{transform_indices = @transform_0, window_bounds = array<i64: 16, 8>}, {pipeline_mode = #tpu.pipeline_mode<synchronous>, transform_indices = @transform_1, window_bounds = array<i64: 8, 512>}, {pipeline_mode = #tpu.pipeline_mode<synchronous>, transform_indices = @transform_2, window_bounds = array<i64: 1, 512>}, {pipeline_mode = #tpu.pipeline_mode<synchronous>, transform_indices = @transform_3, window_bounds = array<i64: 512, 1024>}, {pipeline_mode = #tpu.pipeline_mode<synchronous>, transform_indices = @transform_4, window_bounds = array<i64: 1, 1024>}, {pipeline_mode = #tpu.pipeline_mode<synchronous>, transform_indices = @transform_5, window_bounds = array<i64: 1024, 128>}, {pipeline_mode = #tpu.pipeline_mode<synchronous>, transform_indices = @transform_6, window_bounds = array<i64: 1, 128>}, {transform_indices = @transform_7, window_bounds = array<i64: 16, 128>}]} {
    %c0 = arith.constant 0 : index
    %c0_0 = arith.constant 0 : index
    %0 = vector.load %arg1[%c0, %c0_0] : memref<16x8xf32, #tpu.memory_space<vmem>>, vector<16x8xf32>
    %1 = arith.truncf %0 : vector<16x8xf32> to vector<16x8xbf16>
    %c0_1 = arith.constant 0 : index
    %c0_2 = arith.constant 0 : index
    %2 = vector.load %arg2[%c0_1, %c0_2] : memref<8x512xbf16, #tpu.memory_space<vmem>>, vector<8x512xbf16>
    %cst = arith.constant dense<0.000000e+00> : vector<16x512xf32>
    %3 = tpu.matmul %1, %2, %cst {dimension_numbers = #tpu.dot_dimension_numbers<[1], [0], [0], [1], [0, 0, 1, 1], [], []>} : vector<16x8xbf16>, vector<8x512xbf16>, vector<16x512xf32> -> vector<16x512xf32>
    %c0_3 = arith.constant 0 : index
    %c0_4 = arith.constant 0 : index
    %4 = vector.load %arg3[%c0_3, %c0_4] : memref<1x512xf32, #tpu.memory_space<vmem>>, vector<1x512xf32>
    %5 = vector.broadcast %4 : vector<1x512xf32> to vector<16x512xf32>
    %6 = arith.addf %3, %5 : vector<16x512xf32>
    %cst_5 = arith.constant 0.000000e+00 : f32
    %7 = vector.broadcast %cst_5 : f32 to vector<16x512xf32>
    %8 = arith.maximumf %6, %7 : vector<16x512xf32>
    %9 = arith.truncf %8 : vector<16x512xf32> to vector<16x512xbf16>
    %c0_6 = arith.constant 0 : index
    %c0_7 = arith.constant 0 : index
    %10 = vector.load %arg4[%c0_6, %c0_7] : memref<512x1024xbf16, #tpu.memory_space<vmem>>, vector<512x1024xbf16>
    %cst_8 = arith.constant dense<0.000000e+00> : vector<16x1024xf32>
    %11 = tpu.matmul %9, %10, %cst_8 {dimension_numbers = #tpu.dot_dimension_numbers<[1], [0], [0], [1], [0, 0, 1, 1], [], []>} : vector<16x512xbf16>, vector<512x1024xbf16>, vector<16x1024xf32> -> vector<16x1024xf32>
    %c0_9 = arith.constant 0 : index
    %c0_10 = arith.constant 0 : index
    %12 = vector.load %arg5[%c0_9, %c0_10] : memref<1x1024xf32, #tpu.memory_space<vmem>>, vector<1x1024xf32>
    %13 = vector.broadcast %12 : vector<1x1024xf32> to vector<16x1024xf32>
    %14 = arith.addf %11, %13 : vector<16x1024xf32>
    %cst_11 = arith.constant 0.000000e+00 : f32
    %15 = vector.broadcast %cst_11 : f32 to vector<16x1024xf32>
    %16 = arith.maximumf %14, %15 : vector<16x1024xf32>
    %17 = arith.truncf %16 : vector<16x1024xf32> to vector<16x1024xbf16>
    %c0_12 = arith.constant 0 : index
    %c0_13 = arith.constant 0 : index
    %18 = vector.load %arg6[%c0_12, %c0_13] : memref<1024x128xbf16, #tpu.memory_space<vmem>>, vector<1024x128xbf16>
    %cst_14 = arith.constant dense<0.000000e+00> : vector<16x128xf32>
    %19 = tpu.matmul %17, %18, %cst_14 {dimension_numbers = #tpu.dot_dimension_numbers<[1], [0], [0], [1], [0, 0, 1, 1], [], []>} : vector<16x1024xbf16>, vector<1024x128xbf16>, vector<16x128xf32> -> vector<16x128xf32>
    %c0_15 = arith.constant 0 : index
    %c0_16 = arith.constant 0 : index
    %20 = vector.load %arg7[%c0_15, %c0_16] : memref<1x128xf32, #tpu.memory_space<vmem>>, vector<1x128xf32>
    %21 = vector.broadcast %20 : vector<1x128xf32> to vector<16x128xf32>
    %22 = arith.addf %19, %21 : vector<16x128xf32>
    %cst_17 = arith.constant dense<0xFF800000> : vector<16xf32>
    %23 = vector.multi_reduction <maximumf>, %22, %cst_17 [1] : vector<16x128xf32> to vector<16xf32>
    %24 = vector.shape_cast %23 : vector<16xf32> to vector<16x1xf32>
    %25 = vector.broadcast %24 : vector<16x1xf32> to vector<16x128xf32>
    %26 = arith.subf %22, %25 : vector<16x128xf32>
    %27 = math.exp %26 : vector<16x128xf32>
    %cst_18 = arith.constant dense<0.000000e+00> : vector<16xf32>
    %28 = vector.multi_reduction <add>, %27, %cst_18 [1] : vector<16x128xf32> to vector<16xf32>
    %29 = vector.shape_cast %28 : vector<16xf32> to vector<16x1xf32>
    %30 = tpu.reciprocal %29 : vector<16x1xf32> -> vector<16x1xf32>
    %31 = vector.broadcast %30 : vector<16x1xf32> to vector<16x128xf32>
    %32 = arith.mulf %27, %31 : vector<16x128xf32>
    %c0_19 = arith.constant 0 : index
    %c0_20 = arith.constant 0 : index
    %33 = vector.load %arg8[%c0_19, %c0_20] : memref<16x128xf32, #tpu.memory_space<vmem>>, vector<16x128xf32>
    tpu.vector_store %arg8[%c0_19, %c0_20], %32 {strides = array<i32>} : memref<16x128xf32, #tpu.memory_space<vmem>>, vector<16x128xf32>,
    return
  }
  func.func @transform_0(%arg0: i32) -> (i32, i32) {
    %c0_i32 = arith.constant 0 : i32
    %c0_i32_0 = arith.constant 0 : i32
    return %arg0, %c0_i32 : i32, i32
  }
  func.func @transform_1(%arg0: i32) -> (i32, i32) {
    %c0_i32 = arith.constant 0 : i32
    %c0_i32_0 = arith.constant 0 : i32
    %c0_i32_1 = arith.constant 0 : i32
    return %c0_i32, %c0_i32_0 : i32, i32
  }
  func.func @transform_2(%arg0: i32) -> (i32, i32) {
    %c0_i32 = arith.constant 0 : i32
    %c0_i32_0 = arith.constant 0 : i32
    %c0_i32_1 = arith.constant 0 : i32
    return %c0_i32, %c0_i32_0 : i32, i32
  }
  func.func @transform_3(%arg0: i32) -> (i32, i32) {
    %c0_i32 = arith.constant 0 : i32
    %c0_i32_0 = arith.constant 0 : i32
    %c0_i32_1 = arith.constant 0 : i32
    return %c0_i32, %c0_i32_0 : i32, i32
  }
  func.func @transform_4(%arg0: i32) -> (i32, i32) {
    %c0_i32 = arith.constant 0 : i32
    %c0_i32_0 = arith.constant 0 : i32
    %c0_i32_1 = arith.constant 0 : i32
    return %c0_i32, %c0_i32_0 : i32, i32
  }
  func.func @transform_5(%arg0: i32) -> (i32, i32) {
    %c0_i32 = arith.constant 0 : i32
    %c0_i32_0 = arith.constant 0 : i32
    %c0_i32_1 = arith.constant 0 : i32
    return %c0_i32, %c0_i32_0 : i32, i32
  }
  func.func @transform_6(%arg0: i32) -> (i32, i32) {
    %c0_i32 = arith.constant 0 : i32
    %c0_i32_0 = arith.constant 0 : i32
    %c0_i32_1 = arith.constant 0 : i32
    return %c0_i32, %c0_i32_0 : i32, i32
  }
  func.func @transform_7(%arg0: i32) -> (i32, i32) {
    %c0_i32 = arith.constant 0 : i32
    %c0_i32_0 = arith.constant 0 : i32
    return %arg0, %c0_i32 : i32, i32
  }
}

</mosaic_0001>

<bundles_post_ra>
// kernel: tpu_custom_call.1
= control target key start
LH: loop header
LB: loop body
LE: loop exit
PB: predicated region body
PF: predicated region fallthrough
CT: control target
= control target key end

     0   :  { %12 = vsyncpa [#allocation3], 0  ;;  %s3665_s0 = inlined_call_operand.vmem [shape: f32[16,8], index: 0, kind: input, shape index: {}]   ;;  %s3666_s1 = inlined_call_operand.vmem [shape: bf16[8,512], index: 1, kind: input, shape index: {}]   ;;  %s3667_s2 = inlined_call_operand.vmem [shape: f32[1,512], index: 2, kind: input, shape index: {}]   ;;  %s3668_s3 = inlined_call_operand.hbm [shape: bf16[512,1024], index: 3, kind: input, shape index: {}]   ;;  %s3669_s4 = inlined_call_operand.vmem [shape: f32[1,1024], index: 4, kind: input, shape index: {}]   ;;  %s3670_s5 = inlined_call_operand.hbm [shape: bf16[1024,128], index: 5, kind: input, shape index: {}]   ;;  %s3671_s6 = inlined_call_operand.vmem [shape: f32[1,128], index: 6, kind: input, shape index: {}]   ;;  %s3672_s7 = inlined_call_operand.hbm [shape: f32[16,128], index: 7, kind: output, shape index: {}]  }
   0x1   :  { %13 = vsyncpa [#allocation6], 0 }
   0x2   :  { %14 = vsyncpa [#allocation4], 0  ;;  %s3482_s24 = smov [#allocation2]   ;;  %s3410_s28 = scalar_lea.hbm %s3668_s3, 32768 }
   0x3   :  { %s26_s25 = sshll.u32 %s3482_s24, 4  ;;  %p3411_p0 = scmp.ne.s32.totalorder %s3668_s3, %s3410_s28  ;;  %s27_s25 = int_to_ptr.vmem [resolvable:$true] %s26_s25 }
   0x4   :  { %p3414_p1 = scmp.lt.u32.totalorder %s3410_s28, %s3668_s3 }
   0x6   :  { %p3416_p2 = pnand %p3414_p1, %p3411_p0 }
   0x8   :  { %3419 = shalt.err (!%p3416_p2)
}
   0x9   :  { %s3420_s10 = scalar_lea.vmem %s27_s25, 32768  ;;  %p3425_p4 = scmp.lt.s32.totalorder %s27_s25, %s27_s25 }
   0xa   :  { %p3421_p3 = scmp.ne.s32.totalorder %s27_s25, %s3420_s10  ;;  %p3426_p5 = scmp.lt.s32.totalorder %s3420_s10, %s3420_s10 }
   0xc   :  { %p3427_p6 = por %p3426_p5, %p3425_p4 }
   0xe   :  { %p3428_p7 = pnand %p3427_p6, %p3421_p3 }
  0x10   :  { %3431 = shalt.err (!%p3428_p7)
}
  0x11   :  { %s3483_s11 = smov 512   ;;  %s3484_s12 = smov 32  }
  0x12   :  { %32 = dma.hbm_to_vmem [thread:$0]  %s3668_s3, 32768, %s27_s25, [#allocation3], %s3483_s11, %s3483_s11, %s3484_s12  }
  0x13   :  { %s3485_s15 = smov [#allocation5]   ;;  %s3432_s19 = scalar_lea.hbm %s3670_s5, 8192 }
  0x14   :  { %s40_s16 = sshll.u32 %s3485_s15, 4  ;;  %p3433_p8 = scmp.ne.s32.totalorder %s3670_s5, %s3432_s19  ;;  %s41_s16 = int_to_ptr.vmem [resolvable:$true] %s40_s16 }
  0x15   :  { %p3436_p9 = scmp.lt.u32.totalorder %s3432_s19, %s3670_s5 }
  0x17   :  { %p3438_p10 = pnand %p3436_p9, %p3433_p8 }
  0x19   :  { %3441 = shalt.err (!%p3438_p10)
}
  0x1a   :  { %s3442_s24 = scalar_lea.vmem %s41_s16, 8192  ;;  %p3447_p12 = scmp.lt.s32.totalorder %s41_s16, %s41_s16 }
  0x1b   :  { %p3443_p11 = scmp.ne.s32.totalorder %s41_s16, %s3442_s24  ;;  %p3448_p13 = scmp.lt.s32.totalorder %s3442_s24, %s3442_s24 }
  0x1d   :  { %p3449_p0 = por %p3448_p13, %p3447_p12 }
  0x1f   :  { %p3450_p1 = pnand %p3449_p0, %p3443_p11 }
  0x21   :  { %3453 = shalt.err (!%p3450_p1)
}
  0x22   :  { %s3486_s3 = smov 64   ;;  %s3487_s25 = smov 4  }
  0x23   :  { %46 = dma.hbm_to_vmem [thread:$0]  %s3670_s5, 8192, %s41_s16, [#allocation6], %s3486_s3, %s3486_s3, %s3487_s25  }
  0x24   :  { %3476 = dma.done.wait [#allocation3], 32768  }
  0x25   :  { %3477 = vsyncadd [#allocation3], 4294934528 }
  0x26   :  { %3478 = dma.done.wait [#allocation6], 8192  }
  0x27   :  { %3479 = vsyncadd [#allocation6], 4294959104  ;;  %v3488_v0 = vmov 0   ;;  %v59_v1 = vld [vmem:[%s3666_s1] sm:$0xff]  ;;  %vm97_vm0 = vcmask 1043456   ;;  %v57_v3 = vld [vmem:[%s3665_s0 + $0x8] sm:$0xff] }
  0x28   :  { %142 = vmatprep.mubr.bf16.mxu0 %v3488_v0  ;;  %185 = vmatprep.mubr.bf16.mxu1 %v3488_v0  ;;  %v56_v2 = vld [vmem:[%s3665_s0] sm:$0xff]  ;;  %v2876_v4 = vcombine.high %v59_v1, %v59_v1  ;;  %v2875_v5 = vcombine.low %v59_v1, %v59_v1  ;;  %v60_v6 = vld [vmem:[%s3666_s1 + $0x8] sm:$0xff]  ;;  %v208_v7 = vld [vmem:[#allocation2] sm:$0xff]  ;;  %vm93_vm1 = vcmask 64512  }
  0x29   :  { %v212_v8 = vld [vmem:[#allocation2 + $0x20] sm:$0xff]  ;;  %v2878_v9 = vcombine.high %v60_v6, %v60_v6  ;;  %v2877_v10 = vcombine.low %v60_v6, %v60_v6  ;;  %v209_v12 = vld [vmem:[#allocation2 + $0x8] sm:$0xff]  ;;  %v58_v16 = vpack.c.bf16 %v57_v3, %v56_v2 }
  0x2a   :  { %v2884_v11 = vcombine.high %v208_v7, %v212_v8  ;;  %v213_v13 = vld [vmem:[#allocation2 + $0x28] sm:$0xff]  ;;  %v216_v14 = vld [vmem:[#allocation2 + $0x40] sm:$0xff]  ;;  %2879 = vmatprep.subr.msk.bf16.mxu0 %vm97_vm0, %v2876_v4  ;;  %v99_v15 = vsel %vm97_vm0, %v2875_v5, 0  ;;  %v2883_v22 = vcombine.low %v208_v7, %v212_v8 }
  0x2b   :  { %v2886_v17 = vcombine.high %v209_v12, %v213_v13  ;;  %v220_v18 = vld [vmem:[#allocation2 + $0x60] sm:$0xff]  ;;  %v217_v19 = vld [vmem:[#allocation2 + $0x48] sm:$0xff]  ;;  %111 = vmatpush1.bf16.msra.mxu0 %v99_v15  ;;  %2881 = vmatprep.subr.msk.bf16.mxu1 %vm97_vm0, %v2878_v9  ;;  %v105_v21 = vsel %vm97_vm0, %v2877_v10, 0  ;;  %v2885_v23 = vcombine.low %v209_v12, %v213_v13 }
  0x2c   :  { %v221_v20 = vld [vmem:[#allocation2 + $0x68] sm:$0xff]  ;;  %154 = vmatpush1.bf16.msra.mxu1 %v105_v21  ;;  %1786 = vmatprep.subr.bf16.mxu0 %v2884_v11  ;;  %v2892_v24 = vcombine.high %v216_v14, %v220_v18  ;;  %v224_v26 = vld [vmem:[#allocation2 + $0x80] sm:$0xff]  ;;  %v2891_v30 = vcombine.low %v216_v14, %v220_v18 }
  0x2d   :  { %1872 = vmatprep.subr.bf16.mxu1 %v2886_v17  ;;  %v2894_v25 = vcombine.high %v217_v19, %v221_v20  ;;  %v228_v27 = vld [vmem:[#allocation2 + $0xa0] sm:$0xff]  ;;  %v225_v28 = vld [vmem:[#allocation2 + $0x88] sm:$0xff]  ;;  %v2893_v31 = vcombine.low %v217_v19, %v221_v20 }
  0x2e   :  { %2880 = vmatmul.mubr.msk.bf16.vlgmr.msra.gmra.mrb[0].mxu0 %vm93_vm1, %v58_v16  ;;  %v229_v29 = vld [vmem:[#allocation2 + $0xa8] sm:$0xff]  ;;  %v2900_v32 = vcombine.high %v224_v26, %v228_v27  ;;  %v232_v34 = vld [vmem:[#allocation2 + $0xc0] sm:$0xff]  ;;  %v2899_v38 = vcombine.low %v224_v26, %v228_v27 }
  0x2f   :  { %2882 = vmatmul.mubr.msk.bf16.vlgmr.msra.gmra.mrb[0].mxu1 %vm93_vm1, %v58_v16  ;;  %1787 = vmatpush1.bf16.msra.mxu0 %v2883_v22  ;;  %v2902_v33 = vcombine.high %v225_v28, %v229_v29  ;;  %v236_v35 = vld [vmem:[#allocation2 + $0xe0] sm:$0xff]  ;;  %v233_v36 = vld [vmem:[#allocation2 + $0xc8] sm:$0xff]  ;;  %v2901_v39 = vcombine.low %v225_v28, %v229_v29 }
  0x30   :  { %1873 = vmatpush1.bf16.msra.mxu1 %v2885_v23  ;;  %1788 = vmatprep.subr.bf16.mxu0 %v2892_v24  ;;  %v237_v37 = vld [vmem:[#allocation2 + $0xe8] sm:$0xff]  ;;  %v2908_v40 = vcombine.high %v232_v34, %v236_v35  ;;  %v240_v42 = vld [vmem:[#allocation2 + $0x100] sm:$0xff]  ;;  %v2907_v46 = vcombine.low %v232_v34, %v236_v35 }
  0x31   :  { %1874 = vmatprep.subr.bf16.mxu1 %v2894_v25  ;;  %v2910_v41 = vcombine.high %v233_v36, %v237_v37  ;;  %v244_v43 = vld [vmem:[#allocation2 + $0x120] sm:$0xff]  ;;  %v241_v44 = vld [vmem:[#allocation2 + $0x108] sm:$0xff]  ;;  %v2909_v47 = vcombine.low %v233_v36, %v237_v37 }
  0x32   :  { %v245_v45 = vld [vmem:[#allocation2 + $0x128] sm:$0xff]  ;;  %v2916_v48 = vcombine.high %v240_v42, %v244_v43  ;;  %v248_v50 = vld [vmem:[#allocation2 + $0x140] sm:$0xff]  ;;  %v2915_v54 = vcombine.low %v240_v42, %v244_v43 }
  0x33   :  { %1789 = vmatpush1.bf16.msra.mxu0 %v2891_v30  ;;  %v2918_v49 = vcombine.high %v241_v44, %v245_v45  ;;  %v252_v51 = vld [vmem:[#allocation2 + $0x160] sm:$0xff]  ;;  %v249_v52 = vld [vmem:[#allocation2 + $0x148] sm:$0xff]  ;;  %v2917_v57 = vcombine.low %v241_v44, %v245_v45 }
  0x34   :  { %1875 = vmatpush1.bf16.msra.mxu1 %v2893_v31  ;;  %1790 = vmatprep.subr.bf16.mxu0 %v2900_v32  ;;  %v253_v53 = vld [vmem:[#allocation2 + $0x168] sm:$0xff]  ;;  %v256_v55 = vld [vmem:[#allocation2 + $0x180] sm:$0xff]  ;;  %v2924_v58 = vcombine.high %v248_v50, %v252_v51  ;;  %v2923_v62 = vcombine.low %v248_v50, %v252_v51 }
  0x35   :  { %1876 = vmatprep.subr.bf16.mxu1 %v2902_v33  ;;  %v260_v56 = vld [vmem:[#allocation2 + $0x1a0] sm:$0xff]  ;;  %v257_v59 = vld [vmem:[#allocation2 + $0x188] sm:$0xff]  ;;  %v2926_v61 = vcombine.high %v249_v52, %v253_v53  ;;  %v2925_v1 = vcombine.low %v249_v52, %v253_v53 }
  0x36   :  { %v261_v60 = vld [vmem:[#allocation2 + $0x1a8] sm:$0xff]  ;;  %v264_v63 = vld [vmem:[#allocation2 + $0x1c0] sm:$0xff]  ;;  %v2932_v2 = vcombine.high %v256_v55, %v260_v56  ;;  %v2931_v6 = vcombine.low %v256_v55, %v260_v56 }
  0x37   :  { %1791 = vmatpush1.bf16.msra.mxu0 %v2899_v38  ;;  %v268_v0 = vld [vmem:[#allocation2 + $0x1e0] sm:$0xff]  ;;  %v265_v3 = vld [vmem:[#allocation2 + $0x1c8] sm:$0xff]  ;;  %v2934_v5 = vcombine.high %v257_v59, %v261_v60  ;;  %v2933_v9 = vcombine.low %v257_v59, %v261_v60 }
  0x38   :  { %1877 = vmatpush1.bf16.msra.mxu1 %v2901_v39  ;;  %1792 = vmatprep.subr.bf16.mxu0 %v2908_v40  ;;  %v269_v4 = vld [vmem:[#allocation2 + $0x1e8] sm:$0xff]  ;;  %v272_v7 = vld [vmem:[#allocation2 + $0x200] sm:$0xff]  ;;  %v2940_v10 = vcombine.high %v264_v63, %v268_v0  ;;  %v2939_v14 = vcombine.low %v264_v63, %v268_v0 }
  0x39   :  { %1878 = vmatprep.subr.bf16.mxu1 %v2910_v41  ;;  %v276_v8 = vld [vmem:[#allocation2 + $0x220] sm:$0xff]  ;;  %v273_v11 = vld [vmem:[#allocation2 + $0x208] sm:$0xff]  ;;  %v2942_v13 = vcombine.high %v265_v3, %v269_v4  ;;  %v2941_v17 = vcombine.low %v265_v3, %v269_v4 }
  0x3a   :  { %v277_v12 = vld [vmem:[#allocation2 + $0x228] sm:$0xff]  ;;  %v280_v15 = vld [vmem:[#allocation2 + $0x240] sm:$0xff]  ;;  %v2948_v18 = vcombine.high %v272_v7, %v276_v8  ;;  %v2947_v22 = vcombine.low %v272_v7, %v276_v8 }
  0x3b   :  { %1793 = vmatpush1.bf16.msra.mxu0 %v2907_v46  ;;  %v284_v16 = vld [vmem:[#allocation2 + $0x260] sm:$0xff]  ;;  %v281_v19 = vld [vmem:[#allocation2 + $0x248] sm:$0xff]  ;;  %v2950_v21 = vcombine.high %v273_v11, %v277_v12  ;;  %v2949_v25 = vcombine.low %v273_v11, %v277_v12 }
  0x3c   :  { %1879 = vmatpush1.bf16.msra.mxu1 %v2909_v47  ;;  %1794 = vmatprep.subr.bf16.mxu0 %v2916_v48  ;;  %v285_v20 = vld [vmem:[#allocation2 + $0x268] sm:$0xff]  ;;  %v288_v23 = vld [vmem:[#allocation2 + $0x280] sm:$0xff]  ;;  %v2956_v26 = vcombine.high %v280_v15, %v284_v16  ;;  %v2955_v30 = vcombine.low %v280_v15, %v284_v16 }
  0x3d   :  { %1880 = vmatprep.subr.bf16.mxu1 %v2918_v49  ;;  %v292_v24 = vld [vmem:[#allocation2 + $0x2a0] sm:$0xff]  ;;  %v289_v27 = vld [vmem:[#allocation2 + $0x288] sm:$0xff]  ;;  %v2958_v29 = vcombine.high %v281_v19, %v285_v20  ;;  %v2957_v33 = vcombine.low %v281_v19, %v285_v20  ;;  %v63_v20 = vlaneseq }
  0x3e   :  { %v293_v28 = vld [vmem:[#allocation2 + $0x2a8] sm:$0xff]  ;;  %v296_v31 = vld [vmem:[#allocation2 + $0x2c0] sm:$0xff]  ;;  %v2964_v34 = vcombine.high %v288_v23, %v292_v24  ;;  %v2963_v38 = vcombine.low %v288_v23, %v292_v24  ;;  %v61_v23 = vld [vmem:[%s3667_s2] sm:$0xf] }
  0x3f   :  { %1795 = vmatpush1.bf16.msra.mxu0 %v2915_v54  ;;  %v300_v32 = vld [vmem:[#allocation2 + $0x2e0] sm:$0xff]  ;;  %v297_v35 = vld [vmem:[#allocation2 + $0x2c8] sm:$0xff]  ;;  %v2966_v37 = vcombine.high %v289_v27, %v293_v28  ;;  %v2965_v41 = vcombine.low %v289_v27, %v293_v28 }
  0x40   :  { %1881 = vmatpush1.bf16.msra.mxu1 %v2917_v57  ;;  %1796 = vmatprep.subr.bf16.mxu0 %v2924_v58  ;;  %v301_v36 = vld [vmem:[#allocation2 + $0x2e8] sm:$0xff]  ;;  %v304_v39 = vld [vmem:[#allocation2 + $0x300] sm:$0xff]  ;;  %v2972_v42 = vcombine.high %v296_v31, %v300_v32  ;;  %v2971_v46 = vcombine.low %v296_v31, %v300_v32 }
  0x41   :  { %1882 = vmatprep.subr.bf16.mxu1 %v2926_v61  ;;  %v308_v40 = vld [vmem:[#allocation2 + $0x320] sm:$0xff]  ;;  %v305_v43 = vld [vmem:[#allocation2 + $0x308] sm:$0xff]  ;;  %v2974_v45 = vcombine.high %v297_v35, %v301_v36  ;;  %v2973_v49 = vcombine.low %v297_v35, %v301_v36 }
  0x42   :  { %v309_v44 = vld [vmem:[#allocation2 + $0x328] sm:$0xff]  ;;  %v312_v47 = vld [vmem:[#allocation2 + $0x340] sm:$0xff]  ;;  %v2980_v50 = vcombine.high %v304_v39, %v308_v40  ;;  %v2979_v54 = vcombine.low %v304_v39, %v308_v40 }
  0x43   :  { %1797 = vmatpush1.bf16.msra.mxu0 %v2923_v62  ;;  %v316_v48 = vld [vmem:[#allocation2 + $0x360] sm:$0xff]  ;;  %v313_v51 = vld [vmem:[#allocation2 + $0x348] sm:$0xff]  ;;  %v2982_v53 = vcombine.high %v305_v43, %v309_v44  ;;  %v2981_v55 = vcombine.low %v305_v43, %v309_v44 }
  0x44   :  { %1883 = vmatpush1.bf16.msra.mxu1 %v2925_v1  ;;  %1798 = vmatprep.subr.bf16.mxu0 %v2932_v2  ;;  %v317_v52 = vld [vmem:[#allocation2 + $0x368] sm:$0xff]  ;;  %v2988_v56 = vcombine.high %v312_v47, %v316_v48  ;;  %v2987_v58 = vcombine.low %v312_v47, %v316_v48  ;;  %v320_v60 = vld [vmem:[#allocation2 + $0x380] sm:$0xff] }
  0x45   :  { %1884 = vmatprep.subr.bf16.mxu1 %v2934_v5  ;;  %v2990_v57 = vcombine.high %v313_v51, %v317_v52  ;;  %v2989_v59 = vcombine.low %v313_v51, %v317_v52  ;;  %v324_v61 = vld [vmem:[#allocation2 + $0x3a0] sm:$0xff]  ;;  %v321_v62 = vld [vmem:[#allocation2 + $0x388] sm:$0xff] }
  0x46   :  { %v2996_v63 = vcombine.high %v320_v60, %v324_v61  ;;  %v325_v0 = vld [vmem:[#allocation2 + $0x3a8] sm:$0xff]  ;;  %v2995_v1 = vcombine.low %v320_v60, %v324_v61  ;;  %v328_v4 = vld [vmem:[#allocation2 + $0x3c0] sm:$0xff] }
  0x47   :  { %1799 = vmatpush1.bf16.msra.mxu0 %v2931_v6  ;;  %v2997_v2 = vcombine.low %v321_v62, %v325_v0  ;;  %v2998_v3 = vcombine.high %v321_v62, %v325_v0  ;;  %v332_v5 = vld [vmem:[#allocation2 + $0x3e0] sm:$0xff]  ;;  %v329_v6 = vld [vmem:[#allocation2 + $0x3c8] sm:$0xff] }
  0x48   :  { %1885 = vmatpush1.bf16.msra.mxu1 %v2933_v9  ;;  %1800 = vmatprep.subr.bf16.mxu0 %v2940_v10  ;;  %v3004_v7 = vcombine.high %v328_v4, %v332_v5  ;;  %v333_v8 = vld [vmem:[#allocation2 + $0x3e8] sm:$0xff]  ;;  %v3003_v9 = vcombine.low %v328_v4, %v332_v5  ;;  %v3572_v12 = vld [vmem:[#allocation2 + $0x400] sm:$0xff] }
  0x49   :  { %1886 = vmatprep.subr.bf16.mxu1 %v2942_v13  ;;  %v3005_v10 = vcombine.low %v329_v6, %v333_v8  ;;  %v3006_v11 = vcombine.high %v329_v6, %v333_v8  ;;  %v3574_v13 = vld [vmem:[#allocation2 + $0x420] sm:$0xff]  ;;  %v341_v16 = vld [vmem:[#allocation2 + $0x428] sm:$0xff] }
  0x4a   :  { %v3012_v15 = vcombine.high %v3572_v12, %v3574_v13  ;;  %v352_v0 = vld [vmem:[#allocation2 + $0x480] sm:$0xff]  ;;  %v357_v4 = vld [vmem:[#allocation2 + $0x4a8] sm:$0xff] }
  0x4b   :  { %1801 = vmatpush1.bf16.msra.mxu0 %v2939_v14  ;;  %v3576_v14 = vld [vmem:[#allocation2 + $0x408] sm:$0xff] }
  0x4c   :  { %1887 = vmatpush1.bf16.msra.mxu1 %v2941_v17  ;;  %1802 = vmatprep.subr.bf16.mxu0 %v2948_v18  ;;  %v3011_v17 = vcombine.low %v3572_v12, %v3574_v13  ;;  %v3013_v18 = vcombine.low %v3576_v14, %v341_v16  ;;  %v3014_v19 = vcombine.high %v3576_v14, %v341_v16  ;;  %v365_v12 = vld [vmem:[#allocation2 + $0x4e8] sm:$0xff] }
  0x4d   :  { %1888 = vmatprep.subr.bf16.mxu1 %v2950_v21  ;;  %v3584_v21 = vshrl.u32 %v63_v20, 7  ;;  %v373_v20 = vld [vmem:[#allocation2 + $0x528] sm:$0xff] }
  0x4f   :  { %1803 = vmatpush1.bf16.msra.mxu0 %v2947_v22  ;;  %v65_v22 = vsub.s32 0, %v3584_v21  ;;  %v69_v24 = vsub.s32 1, %v3584_v21 }
  0x50   :  { %1889 = vmatpush1.bf16.msra.mxu1 %v2949_v25  ;;  %1804 = vmatprep.subr.bf16.mxu0 %v2956_v26  ;;  %v73_v25 = vsub.s32 2, %v3584_v21  ;;  %v77_v26 = vsub.s32 3, %v3584_v21 }
  0x51   :  { %1890 = vmatprep.subr.bf16.mxu1 %v2958_v29  ;;  %v66_v27 = vrot.slane %v61_v23, %v65_v22  ;;  %v70_v28 = vrot.slane %v61_v23, %v69_v24 }
  0x52   :  { %v74_v29 = vrot.slane %v61_v23, %v73_v25 }
  0x53   :  { %1805 = vmatpush1.bf16.msra.mxu0 %v2955_v30  ;;  %v78_v30 = vrot.slane %v61_v23, %v77_v26 }
  0x54   :  { %1891 = vmatpush1.bf16.msra.mxu1 %v2957_v33  ;;  %1806 = vmatprep.subr.bf16.mxu0 %v2964_v34 }
  0x55   :  { %1892 = vmatprep.subr.bf16.mxu1 %v2966_v37 }
  0x57   :  { %1807 = vmatpush1.bf16.msra.mxu0 %v2963_v38 }
  0x58   :  { %1893 = vmatpush1.bf16.msra.mxu1 %v2965_v41  ;;  %1808 = vmatprep.subr.bf16.mxu0 %v2972_v42 }
  0x59   :  { %1894 = vmatprep.subr.bf16.mxu1 %v2974_v45 }
  0x5b   :  { %1809 = vmatpush1.bf16.msra.mxu0 %v2971_v46 }
  0x5c   :  { %1895 = vmatpush1.bf16.msra.mxu1 %v2973_v49  ;;  %1810 = vmatprep.subr.bf16.mxu0 %v2980_v50  ;;  %v344_v49 = vld [vmem:[#allocation2 + $0x440] sm:$0xff] }
  0x5d   :  { %1896 = vmatprep.subr.bf16.mxu1 %v2982_v53 }
  0x5f   :  { %1811 = vmatpush1.bf16.msra.mxu0 %v2979_v54  ;;  %v348_v54 = vld [vmem:[#allocation2 + $0x460] sm:$0xff] }
  0x60   :  { %1897 = vmatpush1.bf16.msra.mxu1 %v2981_v55  ;;  %1812 = vmatprep.subr.bf16.mxu0 %v2988_v56  ;;  %v345_v55 = vld [vmem:[#allocation2 + $0x448] sm:$0xff]  ;;  %v3020_v62 = vcombine.high %v344_v49, %v348_v54  ;;  %v3019_v5 = vcombine.low %v344_v49, %v348_v54  ;;  %v400_v54 = vld [vmem:[#allocation2 + $0x600] sm:$0xff] }
  0x61   :  { %1898 = vmatprep.subr.bf16.mxu1 %v2990_v57  ;;  %v349_v56 = vld [vmem:[#allocation2 + $0x468] sm:$0xff] }
  0x62   :  { %v3021_v6 = vcombine.low %v345_v55, %v349_v56  ;;  %v397_v49 = vld [vmem:[#allocation2 + $0x5e8] sm:$0xff] }
  0x63   :  { %1813 = vmatpush1.bf16.msra.mxu0 %v2987_v58 }
  0x64   :  { %1899 = vmatpush1.bf16.msra.mxu1 %v2989_v59  ;;  %1814 = vmatprep.subr.bf16.mxu0 %v2996_v63  ;;  %v3022_v63 = vcombine.high %v345_v55, %v349_v56  ;;  %v404_v55 = vld [vmem:[#allocation2 + $0x620] sm:$0xff]  ;;  %v401_v56 = vld [vmem:[#allocation2 + $0x608] sm:$0xff] }
  0x65   :  { %1900 = vmatprep.subr.bf16.mxu1 %v2998_v3  ;;  %v353_v3 = vld [vmem:[#allocation2 + $0x488] sm:$0xff] }
  0x66   :  { %v3030_v8 = vcombine.high %v353_v3, %v357_v4  ;;  %v3029_v14 = vcombine.low %v353_v3, %v357_v4  ;;  %v412_v3 = vld [vmem:[#allocation2 + $0x660] sm:$0xff]  ;;  %v409_v4 = vld [vmem:[#allocation2 + $0x648] sm:$0xff] }
  0x67   :  { %1815 = vmatpush1.bf16.msra.mxu0 %v2995_v1 }
  0x68   :  { %1901 = vmatpush1.bf16.msra.mxu1 %v2997_v2  ;;  %1816 = vmatprep.subr.bf16.mxu0 %v3004_v7  ;;  %v356_v2 = vld [vmem:[#allocation2 + $0x4a0] sm:$0xff] }
  0x69   :  { %1902 = vmatprep.subr.bf16.mxu1 %v3006_v11  ;;  %v3028_v7 = vcombine.high %v352_v0, %v356_v2  ;;  %v361_v11 = vld [vmem:[#allocation2 + $0x4c8] sm:$0xff]  ;;  %v3027_v13 = vcombine.low %v352_v0, %v356_v2  ;;  %v408_v2 = vld [vmem:[#allocation2 + $0x640] sm:$0xff] }
  0x6a   :  { %v3038_v16 = vcombine.high %v361_v11, %v365_v12 }
  0x6b   :  { %1817 = vmatpush1.bf16.msra.mxu0 %v3003_v9  ;;  %v360_v9 = vld [vmem:[#allocation2 + $0x4c0] sm:$0xff] }
  0x6c   :  { %1903 = vmatpush1.bf16.msra.mxu1 %v3005_v10  ;;  %1829 = vmatprep.subr.bf16.mxu0 %v3012_v15  ;;  %v364_v10 = vld [vmem:[#allocation2 + $0x4e0] sm:$0xff] }
  0x6d   :  { %1915 = vmatprep.subr.bf16.mxu1 %v3014_v19  ;;  %v3036_v15 = vcombine.high %v360_v9, %v364_v10  ;;  %v369_v19 = vld [vmem:[#allocation2 + $0x508] sm:$0xff]  ;;  %v3035_v23 = vcombine.low %v360_v9, %v364_v10  ;;  %v416_v10 = vld [vmem:[#allocation2 + $0x680] sm:$0xff] }
 0x101   :  { %v144_v31 = vpop.f32.mrb[0].mxu0 }
 0x102   :  { %v145_v32 = vadd.f32 %v144_v31, %v66_v27  ;;  %v146_v33 = vpop.f32.mrb[1].mxu0  ;;  %v187_v34 = vpop.f32.mrb[0].mxu1  ;;  %v380_v31 = vld [vmem:[#allocation2 + $0x560] sm:$0xff] }
 0x103   :  { %v147_v35 = vadd.f32 %v146_v33, %v70_v28  ;;  %v148_v36 = vpop.f32.mrb[2].mxu0  ;;  %v188_v37 = vadd.f32 %v187_v34, %v74_v29  ;;  %v189_v38 = vpop.f32.mrb[1].mxu1  ;;  %v381_v33 = vld [vmem:[#allocation2 + $0x568] sm:$0xff] }
 0x104   :  { %v149_v39 = vadd.f32 %v148_v36, %v66_v27  ;;  %v150_v40 = vpop.f32.mrb[3].mxu0  ;;  %v190_v41 = vadd.f32 %v189_v38, %v78_v30  ;;  %v191_v42 = vpop.f32.mrb[2].mxu1  ;;  %v196_v47 = vmax.f32 %v145_v32, 0.0  ;;  %v3037_v27 = vcombine.low %v361_v11, %v365_v12  ;;  %v377_v32 = vld [vmem:[#allocation2 + $0x548] sm:$0xff]  ;;  %v384_v38 = vld [vmem:[#allocation2 + $0x580] sm:$0xff] }
 0x105   :  { %v151_v43 = vadd.f32 %v150_v40, %v70_v28  ;;  %v198_v44 = vmax.f32 %v188_v37, 0.0  ;;  %v192_v45 = vadd.f32 %v191_v42, %v74_v29  ;;  %v193_v46 = vpop.f32.mrb[3].mxu1  ;;  %v197_v52 = vmax.f32 %v147_v35, 0.0  ;;  %v385_v40 = vld [vmem:[#allocation2 + $0x588] sm:$0xff]  ;;  %v420_v11 = vld [vmem:[#allocation2 + $0x6a0] sm:$0xff] }
 0x106   :  { %v200_v48 = vmax.f32 %v149_v39, 0.0  ;;  %v199_v50 = vmax.f32 %v190_v41, 0.0  ;;  %v194_v51 = vadd.f32 %v193_v46, %v78_v30  ;;  %v3046_v29 = vcombine.high %v369_v19, %v373_v20  ;;  %v376_v30 = vld [vmem:[#allocation2 + $0x540] sm:$0xff]  ;;  %v389_v41 = vld [vmem:[#allocation2 + $0x5a8] sm:$0xff] }
 0x107   :  { %v201_v53 = vmax.f32 %v151_v43, 0.0  ;;  %v202_v57 = vmax.f32 %v192_v45, 0.0  ;;  %v3045_v35 = vcombine.low %v369_v19, %v373_v20  ;;  %v3052_v36 = vcombine.high %v376_v30, %v380_v31  ;;  %v388_v39 = vld [vmem:[#allocation2 + $0x5a0] sm:$0xff]  ;;  %v417_v12 = vld [vmem:[#allocation2 + $0x688] sm:$0xff] }
 0x108   :  { %v3601_v58 = vpack.c.bf16 %v200_v48, %v196_v47  ;;  %v203_v59 = vmax.f32 %v194_v51, 0.0  ;;  %v3054_v37 = vcombine.high %v377_v32, %v381_v33  ;;  %v3051_v42 = vcombine.low %v376_v30, %v380_v31  ;;  %v392_v46 = vld [vmem:[#allocation2 + $0x5c0] sm:$0xff]  ;;  %v393_v48 = vld [vmem:[#allocation2 + $0x5c8] sm:$0xff] }
 0x109   :  { %v3603_v60 = vpack.c.bf16 %v201_v53, %v197_v52  ;;  %v3605_v61 = vpack.c.bf16 %v202_v57, %v198_v44  ;;  %v3053_v43 = vcombine.low %v377_v32, %v381_v33  ;;  %v3060_v44 = vcombine.high %v384_v38, %v388_v39  ;;  %v396_v47 = vld [vmem:[#allocation2 + $0x5e0] sm:$0xff]  ;;  %v405_v57 = vld [vmem:[#allocation2 + $0x628] sm:$0xff] }
 0x10a   :  { %v3607_v1 = vpack.c.bf16 %v203_v59, %v199_v50  ;;  %v3062_v45 = vcombine.high %v385_v40, %v389_v41  ;;  %v3059_v50 = vcombine.low %v384_v38, %v388_v39  ;;  %v3061_v51 = vcombine.low %v385_v40, %v389_v41  ;;  %v428_v19 = vld [vmem:[#allocation2 + $0x6e0] sm:$0xff]  ;;  %v425_v20 = vld [vmem:[#allocation2 + $0x6c8] sm:$0xff] }
 0x10b   :  { %1818 = vmatprep.mubr.bf16.mxu0 %v3603_v60  ;;  %1904 = vmatprep.mubr.bf16.mxu1 %v3603_v60  ;;  %v3068_v52 = vcombine.high %v392_v46, %v396_v47  ;;  %v3070_v53 = vcombine.high %v393_v48, %v397_v49  ;;  %v3067_v59 = vcombine.low %v392_v46, %v396_v47  ;;  %v432_v31 = vld [vmem:[#allocation2 + $0x700] sm:$0xff]  ;;  %v433_v33 = vld [vmem:[#allocation2 + $0x708] sm:$0xff] }
 0x10c   :  { %1819 = vmatmul.mubr.bf16.vlgmr.msra.gmra.mrb[4].mxu0 %v3601_v58  ;;  %1905 = vmatmul.mubr.bf16.vlgmr.msra.gmra.mrb[4].mxu1 %v3601_v58  ;;  %v3078_v0 = vcombine.high %v401_v56, %v405_v57  ;;  %v436_v32 = vld [vmem:[#allocation2 + $0x720] sm:$0xff]  ;;  %v441_v41 = vld [vmem:[#allocation2 + $0x748] sm:$0xff] }
 0x10d   :  { %1830 = vmatpush1.bf16.msra.mxu0 %v3011_v17  ;;  %1916 = vmatpush1.bf16.msra.mxu1 %v3013_v18  ;;  %v368_v17 = vld [vmem:[#allocation2 + $0x500] sm:$0xff] }
 0x10e   :  { %1831 = vmatprep.subr.bf16.mxu0 %v3020_v62  ;;  %1917 = vmatprep.subr.bf16.mxu1 %v3022_v63  ;;  %v372_v18 = vld [vmem:[#allocation2 + $0x520] sm:$0xff]  ;;  %v3069_v62 = vcombine.low %v393_v48, %v397_v49  ;;  %v3076_v63 = vcombine.high %v400_v54, %v404_v55  ;;  %v449_v49 = vld [vmem:[#allocation2 + $0x788] sm:$0xff] }
 0x10f   :  { %1861 = vmatprep.mubr.bf16.mxu0 %v3607_v1  ;;  %1947 = vmatprep.mubr.bf16.mxu1 %v3607_v1  ;;  %v3044_v28 = vcombine.high %v368_v17, %v372_v18  ;;  %v3043_v34 = vcombine.low %v368_v17, %v372_v18  ;;  %v424_v18 = vld [vmem:[#allocation2 + $0x6c0] sm:$0xff] }
 0x110   :  { %v440_v39 = vld [vmem:[#allocation2 + $0x740] sm:$0xff] }
 0x111   :  { %1832 = vmatpush1.bf16.msra.mxu0 %v3019_v5  ;;  %1918 = vmatpush1.bf16.msra.mxu1 %v3021_v6  ;;  %v413_v5 = vld [vmem:[#allocation2 + $0x668] sm:$0xff]  ;;  %v3075_v6 = vcombine.low %v400_v54, %v404_v55  ;;  %v444_v40 = vld [vmem:[#allocation2 + $0x760] sm:$0xff] }
 0x112   :  { %1833 = vmatprep.subr.bf16.mxu0 %v3028_v7  ;;  %1919 = vmatprep.subr.bf16.mxu1 %v3030_v8  ;;  %v3077_v7 = vcombine.low %v401_v56, %v405_v57  ;;  %v3084_v8 = vcombine.high %v408_v2, %v412_v3  ;;  %v3086_v9 = vcombine.high %v409_v4, %v413_v5  ;;  %v448_v47 = vld [vmem:[#allocation2 + $0x780] sm:$0xff]  ;;  %v457_v57 = vld [vmem:[#allocation2 + $0x7c8] sm:$0xff] }
 0x113   :  { %v452_v48 = vld [vmem:[#allocation2 + $0x7a0] sm:$0xff] }
 0x114   :  { %v456_v55 = vld [vmem:[#allocation2 + $0x7c0] sm:$0xff] }
 0x115   :  { %1834 = vmatpush1.bf16.msra.mxu0 %v3027_v13  ;;  %1920 = vmatpush1.bf16.msra.mxu1 %v3029_v14  ;;  %v421_v13 = vld [vmem:[#allocation2 + $0x6a8] sm:$0xff]  ;;  %v3083_v14 = vcombine.low %v408_v2, %v412_v3  ;;  %v460_v56 = vld [vmem:[#allocation2 + $0x7e0] sm:$0xff]  ;;  %v210_v3 = vld [vmem:[#allocation2 + $0x10] sm:$0xff] }
 0x116   :  { %1835 = vmatprep.subr.bf16.mxu0 %v3036_v15  ;;  %1921 = vmatprep.subr.bf16.mxu1 %v3038_v16  ;;  %v3085_v15 = vcombine.low %v409_v4, %v413_v5  ;;  %v3092_v16 = vcombine.high %v416_v10, %v420_v11  ;;  %v3094_v17 = vcombine.high %v417_v12, %v421_v13  ;;  %v214_v4 = vld [vmem:[#allocation2 + $0x30] sm:$0xff]  ;;  %v211_v5 = vld [vmem:[#allocation2 + $0x18] sm:$0xff] }
 0x119   :  { %1836 = vmatpush1.bf16.msra.mxu0 %v3035_v23  ;;  %1922 = vmatpush1.bf16.msra.mxu1 %v3037_v27  ;;  %v429_v23 = vld [vmem:[#allocation2 + $0x6e8] sm:$0xff]  ;;  %v3091_v27 = vcombine.low %v416_v10, %v420_v11  ;;  %v218_v11 = vld [vmem:[#allocation2 + $0x50] sm:$0xff] }
 0x11a   :  { %1837 = vmatprep.subr.bf16.mxu0 %v3044_v28  ;;  %1923 = vmatprep.subr.bf16.mxu1 %v3046_v29  ;;  %v3093_v28 = vcombine.low %v417_v12, %v421_v13  ;;  %v3100_v29 = vcombine.high %v424_v18, %v428_v19  ;;  %v3102_v30 = vcombine.high %v425_v20, %v429_v23  ;;  %v222_v12 = vld [vmem:[#allocation2 + $0x70] sm:$0xff]  ;;  %v219_v13 = vld [vmem:[#allocation2 + $0x58] sm:$0xff] }
 0x11d   :  { %1838 = vmatpush1.bf16.msra.mxu0 %v3043_v34  ;;  %1924 = vmatpush1.bf16.msra.mxu1 %v3045_v35  ;;  %v437_v34 = vld [vmem:[#allocation2 + $0x728] sm:$0xff]  ;;  %v3099_v35 = vcombine.low %v424_v18, %v428_v19  ;;  %v226_v19 = vld [vmem:[#allocation2 + $0x90] sm:$0xff] }
 0x11e   :  { %1839 = vmatprep.subr.bf16.mxu0 %v3052_v36  ;;  %1925 = vmatprep.subr.bf16.mxu1 %v3054_v37  ;;  %v3101_v36 = vcombine.low %v425_v20, %v429_v23  ;;  %v3108_v37 = vcombine.high %v432_v31, %v436_v32  ;;  %v3110_v38 = vcombine.high %v433_v33, %v437_v34  ;;  %v230_v20 = vld [vmem:[#allocation2 + $0xb0] sm:$0xff]  ;;  %v227_v23 = vld [vmem:[#allocation2 + $0x98] sm:$0xff] }
 0x121   :  { %1840 = vmatpush1.bf16.msra.mxu0 %v3051_v42  ;;  %1926 = vmatpush1.bf16.msra.mxu1 %v3053_v43  ;;  %v445_v42 = vld [vmem:[#allocation2 + $0x768] sm:$0xff]  ;;  %v3107_v43 = vcombine.low %v432_v31, %v436_v32  ;;  %v234_v32 = vld [vmem:[#allocation2 + $0xd0] sm:$0xff] }
 0x122   :  { %1841 = vmatprep.subr.bf16.mxu0 %v3060_v44  ;;  %1927 = vmatprep.subr.bf16.mxu1 %v3062_v45  ;;  %v3109_v44 = vcombine.low %v433_v33, %v437_v34  ;;  %v3116_v45 = vcombine.high %v440_v39, %v444_v40  ;;  %v3118_v46 = vcombine.high %v441_v41, %v445_v42  ;;  %v238_v33 = vld [vmem:[#allocation2 + $0xf0] sm:$0xff]  ;;  %v235_v34 = vld [vmem:[#allocation2 + $0xd8] sm:$0xff] }
 0x125   :  { %1842 = vmatpush1.bf16.msra.mxu0 %v3059_v50  ;;  %1928 = vmatpush1.bf16.msra.mxu1 %v3061_v51  ;;  %v453_v50 = vld [vmem:[#allocation2 + $0x7a8] sm:$0xff]  ;;  %v3115_v51 = vcombine.low %v440_v39, %v444_v40  ;;  %v242_v40 = vld [vmem:[#allocation2 + $0x110] sm:$0xff] }
 0x126   :  { %1843 = vmatprep.subr.bf16.mxu0 %v3068_v52  ;;  %1929 = vmatprep.subr.bf16.mxu1 %v3070_v53  ;;  %v3117_v52 = vcombine.low %v441_v41, %v445_v42  ;;  %v3124_v53 = vcombine.high %v448_v47, %v452_v48  ;;  %v3126_v54 = vcombine.high %v449_v49, %v453_v50  ;;  %v246_v41 = vld [vmem:[#allocation2 + $0x130] sm:$0xff]  ;;  %v247_v42 = vld [vmem:[#allocation2 + $0x138] sm:$0xff] }
 0x129   :  { %1844 = vmatpush1.bf16.msra.mxu0 %v3067_v59  ;;  %1930 = vmatpush1.bf16.msra.mxu1 %v3069_v62  ;;  %v461_v59 = vld [vmem:[#allocation2 + $0x7e8] sm:$0xff]  ;;  %v3123_v62 = vcombine.low %v448_v47, %v452_v48  ;;  %v250_v47 = vld [vmem:[#allocation2 + $0x150] sm:$0xff] }
 0x12a   :  { %1845 = vmatprep.subr.bf16.mxu0 %v3076_v63  ;;  %1931 = vmatprep.subr.bf16.mxu1 %v3078_v0  ;;  %v3125_v63 = vcombine.low %v449_v49, %v453_v50  ;;  %v3132_v0 = vcombine.high %v456_v55, %v460_v56  ;;  %v3134_v2 = vcombine.high %v457_v57, %v461_v59  ;;  %v254_v48 = vld [vmem:[#allocation2 + $0x170] sm:$0xff]  ;;  %v251_v49 = vld [vmem:[#allocation2 + $0x158] sm:$0xff] }
 0x12b   :  { %v255_v50 = vld [vmem:[#allocation2 + $0x178] sm:$0xff] }
 0x12d   :  { %1846 = vmatpush1.bf16.msra.mxu0 %v3075_v6  ;;  %1932 = vmatpush1.bf16.msra.mxu1 %v3077_v7  ;;  %v215_v6 = vld [vmem:[#allocation2 + $0x38] sm:$0xff]  ;;  %v3131_v7 = vcombine.low %v456_v55, %v460_v56  ;;  %v258_v55 = vld [vmem:[#allocation2 + $0x190] sm:$0xff] }
 0x12e   :  { %1847 = vmatprep.subr.bf16.mxu0 %v3084_v8  ;;  %1933 = vmatprep.subr.bf16.mxu1 %v3086_v9  ;;  %v3133_v8 = vcombine.low %v457_v57, %v461_v59  ;;  %v2888_v9 = vcombine.high %v210_v3, %v214_v4  ;;  %v2890_v10 = vcombine.high %v211_v5, %v215_v6  ;;  %v262_v56 = vld [vmem:[#allocation2 + $0x1b0] sm:$0xff]  ;;  %v259_v57 = vld [vmem:[#allocation2 + $0x198] sm:$0xff] }
 0x12f   :  { %v263_v59 = vld [vmem:[#allocation2 + $0x1b8] sm:$0xff] }
 0x131   :  { %1848 = vmatpush1.bf16.msra.mxu0 %v3083_v14  ;;  %1934 = vmatpush1.bf16.msra.mxu1 %v3085_v15  ;;  %v223_v14 = vld [vmem:[#allocation2 + $0x78] sm:$0xff]  ;;  %v2887_v15 = vcombine.low %v210_v3, %v214_v4  ;;  %v266_v3 = vld [vmem:[#allocation2 + $0x1d0] sm:$0xff] }
 0x132   :  { %1849 = vmatprep.subr.bf16.mxu0 %v3092_v16  ;;  %1935 = vmatprep.subr.bf16.mxu1 %v3094_v17  ;;  %v2889_v16 = vcombine.low %v211_v5, %v215_v6  ;;  %v2896_v17 = vcombine.high %v218_v11, %v222_v12  ;;  %v2898_v18 = vcombine.high %v219_v13, %v223_v14  ;;  %v270_v4 = vld [vmem:[#allocation2 + $0x1f0] sm:$0xff]  ;;  %v267_v5 = vld [vmem:[#allocation2 + $0x1d8] sm:$0xff] }
 0x133   :  { %v271_v6 = vld [vmem:[#allocation2 + $0x1f8] sm:$0xff] }
 0x135   :  { %1850 = vmatpush1.bf16.msra.mxu0 %v3091_v27  ;;  %1936 = vmatpush1.bf16.msra.mxu1 %v3093_v28  ;;  %v231_v27 = vld [vmem:[#allocation2 + $0xb8] sm:$0xff]  ;;  %v2895_v28 = vcombine.low %v218_v11, %v222_v12  ;;  %v274_v11 = vld [vmem:[#allocation2 + $0x210] sm:$0xff] }
 0x136   :  { %1851 = vmatprep.subr.bf16.mxu0 %v3100_v29  ;;  %1937 = vmatprep.subr.bf16.mxu1 %v3102_v30  ;;  %v2897_v29 = vcombine.low %v219_v13, %v223_v14  ;;  %v2904_v30 = vcombine.high %v226_v19, %v230_v20  ;;  %v2906_v31 = vcombine.high %v227_v23, %v231_v27  ;;  %v278_v12 = vld [vmem:[#allocation2 + $0x230] sm:$0xff]  ;;  %v275_v13 = vld [vmem:[#allocation2 + $0x218] sm:$0xff] }
 0x137   :  { %v279_v14 = vld [vmem:[#allocation2 + $0x238] sm:$0xff] }
 0x139   :  { %1852 = vmatpush1.bf16.msra.mxu0 %v3099_v35  ;;  %1938 = vmatpush1.bf16.msra.mxu1 %v3101_v36  ;;  %v239_v35 = vld [vmem:[#allocation2 + $0xf8] sm:$0xff]  ;;  %v2903_v36 = vcombine.low %v226_v19, %v230_v20  ;;  %v282_v19 = vld [vmem:[#allocation2 + $0x250] sm:$0xff] }
 0x13a   :  { %1853 = vmatprep.subr.bf16.mxu0 %v3108_v37  ;;  %1939 = vmatprep.subr.bf16.mxu1 %v3110_v38  ;;  %v2905_v37 = vcombine.low %v227_v23, %v231_v27  ;;  %v2912_v38 = vcombine.high %v234_v32, %v238_v33  ;;  %v2914_v39 = vcombine.high %v235_v34, %v239_v35  ;;  %v286_v20 = vld [vmem:[#allocation2 + $0x270] sm:$0xff]  ;;  %v283_v23 = vld [vmem:[#allocation2 + $0x258] sm:$0xff] }
 0x13b   :  { %v287_v27 = vld [vmem:[#allocation2 + $0x278] sm:$0xff] }
 0x13d   :  { %1854 = vmatpush1.bf16.msra.mxu0 %v3107_v43  ;;  %1940 = vmatpush1.bf16.msra.mxu1 %v3109_v44  ;;  %v2911_v43 = vcombine.low %v234_v32, %v238_v33  ;;  %v2913_v44 = vcombine.low %v235_v34, %v239_v35  ;;  %v290_v32 = vld [vmem:[#allocation2 + $0x290] sm:$0xff]  ;;  %v291_v34 = vld [vmem:[#allocation2 + $0x298] sm:$0xff] }
 0x13e   :  { %1855 = vmatprep.subr.bf16.mxu0 %v3116_v45  ;;  %1941 = vmatprep.subr.bf16.mxu1 %v3118_v46  ;;  %v2920_v45 = vcombine.high %v242_v40, %v246_v41  ;;  %v294_v33 = vld [vmem:[#allocation2 + $0x2b0] sm:$0xff]  ;;  %v295_v35 = vld [vmem:[#allocation2 + $0x2b8] sm:$0xff] }
 0x141   :  { %1856 = vmatpush1.bf16.msra.mxu0 %v3115_v51  ;;  %1942 = vmatpush1.bf16.msra.mxu1 %v3117_v52  ;;  %v2919_v51 = vcombine.low %v242_v40, %v246_v41  ;;  %v298_v40 = vld [vmem:[#allocation2 + $0x2d0] sm:$0xff] }
 0x142   :  { %1857 = vmatprep.subr.bf16.mxu0 %v3124_v53  ;;  %1943 = vmatprep.subr.bf16.mxu1 %v3126_v54  ;;  %v2928_v53 = vcombine.high %v250_v47, %v254_v48  ;;  %v2930_v54 = vcombine.high %v251_v49, %v255_v50  ;;  %v302_v41 = vld [vmem:[#allocation2 + $0x2f0] sm:$0xff] }
 0x145   :  { %1858 = vmatpush1.bf16.msra.mxu0 %v3123_v62  ;;  %1944 = vmatpush1.bf16.msra.mxu1 %v3125_v63  ;;  %v2927_v62 = vcombine.low %v250_v47, %v254_v48  ;;  %v2929_v63 = vcombine.low %v251_v49, %v255_v50  ;;  %v306_v47 = vld [vmem:[#allocation2 + $0x310] sm:$0xff]  ;;  %v307_v49 = vld [vmem:[#allocation2 + $0x318] sm:$0xff] }
 0x146   :  { %1859 = vmatprep.subr.bf16.mxu0 %v3132_v0  ;;  %1945 = vmatprep.subr.bf16.mxu1 %v3134_v2  ;;  %v2936_v0 = vcombine.high %v258_v55, %v262_v56  ;;  %v2938_v2 = vcombine.high %v259_v57, %v263_v59  ;;  %v310_v48 = vld [vmem:[#allocation2 + $0x330] sm:$0xff]  ;;  %v311_v50 = vld [vmem:[#allocation2 + $0x338] sm:$0xff] }
 0x149   :  { %1860 = vmatpush1.bf16.msra.mxu0 %v3131_v7  ;;  %1946 = vmatpush1.bf16.msra.mxu1 %v3133_v8  ;;  %v2935_v7 = vcombine.low %v258_v55, %v262_v56  ;;  %v2937_v8 = vcombine.low %v259_v57, %v263_v59  ;;  %v314_v55 = vld [vmem:[#allocation2 + $0x350] sm:$0xff]  ;;  %v315_v57 = vld [vmem:[#allocation2 + $0x358] sm:$0xff] }
 0x14a   :  { %1958 = vmatprep.subr.bf16.mxu0 %v2888_v9  ;;  %2044 = vmatprep.subr.bf16.mxu1 %v2890_v10  ;;  %v2944_v9 = vcombine.high %v266_v3, %v270_v4  ;;  %v2946_v10 = vcombine.high %v267_v5, %v271_v6  ;;  %v318_v56 = vld [vmem:[#allocation2 + $0x370] sm:$0xff]  ;;  %v319_v59 = vld [vmem:[#allocation2 + $0x378] sm:$0xff] }
 0x14c   :  { %1862 = vmatmul.mubr.bf16.vlgmr.msra.gmra.mrb[4].mxu0 %v3605_v61  ;;  %1948 = vmatmul.mubr.bf16.vlgmr.msra.gmra.mrb[4].mxu1 %v3605_v61 }
 0x14d   :  { %1959 = vmatpush1.bf16.msra.mxu0 %v2887_v15  ;;  %1990 = vmatprep.mubr.bf16.mxu0 %v3603_v60  ;;  %v2943_v15 = vcombine.low %v266_v3, %v270_v4  ;;  %v322_v3 = vld [vmem:[#allocation2 + $0x390] sm:$0xff] }
 0x14e   :  { %2045 = vmatpush1.bf16.msra.mxu1 %v2889_v16  ;;  %2076 = vmatprep.mubr.bf16.mxu1 %v3603_v60  ;;  %v243_v60 = vld [vmem:[#allocation2 + $0x118] sm:$0xff]  ;;  %v2945_v16 = vcombine.low %v267_v5, %v271_v6  ;;  %v326_v4 = vld [vmem:[#allocation2 + $0x3b0] sm:$0xff] }
 0x14f   :  { %1960 = vmatprep.subr.bf16.mxu0 %v2896_v17  ;;  %2046 = vmatprep.subr.bf16.mxu1 %v2898_v18  ;;  %v2922_v46 = vcombine.high %v243_v60, %v247_v42  ;;  %v2921_v52 = vcombine.low %v243_v60, %v247_v42  ;;  %v2952_v17 = vcombine.high %v274_v11, %v278_v12  ;;  %v299_v60 = vld [vmem:[#allocation2 + $0x2d8] sm:$0xff] }
 0x150   :  { %v2954_v18 = vcombine.high %v275_v13, %v279_v14  ;;  %v303_v42 = vld [vmem:[#allocation2 + $0x2f8] sm:$0xff] }
 0x151   :  { %1961 = vmatpush1.bf16.msra.mxu0 %v2895_v28  ;;  %v2951_v28 = vcombine.low %v274_v11, %v278_v12  ;;  %v323_v5 = vld [vmem:[#allocation2 + $0x398] sm:$0xff]  ;;  %v330_v11 = vld [vmem:[#allocation2 + $0x3d0] sm:$0xff] }
 0x152   :  { %2047 = vmatpush1.bf16.msra.mxu1 %v2897_v29  ;;  %1962 = vmatprep.subr.bf16.mxu0 %v2904_v30  ;;  %v2953_v29 = vcombine.low %v275_v13, %v279_v14  ;;  %v2960_v30 = vcombine.high %v282_v19, %v286_v20  ;;  %v327_v6 = vld [vmem:[#allocation2 + $0x3b8] sm:$0xff]  ;;  %v334_v12 = vld [vmem:[#allocation2 + $0x3f0] sm:$0xff] }
 0x153   :  { %2048 = vmatprep.subr.bf16.mxu1 %v2906_v31  ;;  %v2962_v31 = vcombine.high %v283_v23, %v287_v27  ;;  %v331_v13 = vld [vmem:[#allocation2 + $0x3d8] sm:$0xff] }
 0x154   :  { %v335_v14 = vld [vmem:[#allocation2 + $0x3f8] sm:$0xff] }
 0x155   :  { %1963 = vmatpush1.bf16.msra.mxu0 %v2903_v36  ;;  %v2959_v36 = vcombine.low %v282_v19, %v286_v20  ;;  %v338_v19 = vld [vmem:[#allocation2 + $0x410] sm:$0xff] }
 0x156   :  { %2049 = vmatpush1.bf16.msra.mxu1 %v2905_v37  ;;  %1964 = vmatprep.subr.bf16.mxu0 %v2912_v38  ;;  %v2961_v37 = vcombine.low %v283_v23, %v287_v27  ;;  %v2968_v38 = vcombine.high %v290_v32, %v294_v33  ;;  %v342_v20 = vld [vmem:[#allocation2 + $0x430] sm:$0xff]  ;;  %v339_v23 = vld [vmem:[#allocation2 + $0x418] sm:$0xff] }
 0x157   :  { %2050 = vmatprep.subr.bf16.mxu1 %v2914_v39  ;;  %v2970_v39 = vcombine.high %v291_v34, %v295_v35  ;;  %v343_v27 = vld [vmem:[#allocation2 + $0x438] sm:$0xff] }
 0x159   :  { %1965 = vmatpush1.bf16.msra.mxu0 %v2911_v43  ;;  %v2967_v43 = vcombine.low %v290_v32, %v294_v33  ;;  %v346_v32 = vld [vmem:[#allocation2 + $0x450] sm:$0xff] }
 0x15a   :  { %2051 = vmatpush1.bf16.msra.mxu1 %v2913_v44  ;;  %1966 = vmatprep.subr.bf16.mxu0 %v2920_v45  ;;  %v2969_v44 = vcombine.low %v291_v34, %v295_v35  ;;  %v2976_v45 = vcombine.high %v298_v40, %v302_v41  ;;  %v350_v33 = vld [vmem:[#allocation2 + $0x470] sm:$0xff]  ;;  %v3015_v34 = vcombine.low %v338_v19, %v342_v20  ;;  %v347_v35 = vld [vmem:[#allocation2 + $0x458] sm:$0xff] }
 0x15b   :  { %2052 = vmatprep.subr.bf16.mxu1 %v2922_v46  ;;  %v2978_v46 = vcombine.high %v299_v60, %v303_v42 }
 0x15d   :  { %1967 = vmatpush1.bf16.msra.mxu0 %v2919_v51  ;;  %v2975_v51 = vcombine.low %v298_v40, %v302_v41  ;;  %v358_v40 = vld [vmem:[#allocation2 + $0x4b0] sm:$0xff] }
 0x15e   :  { %2053 = vmatpush1.bf16.msra.mxu1 %v2921_v52  ;;  %1968 = vmatprep.subr.bf16.mxu0 %v2928_v53  ;;  %v2977_v52 = vcombine.low %v299_v60, %v303_v42  ;;  %v2984_v53 = vcombine.high %v306_v47, %v310_v48  ;;  %v355_v60 = vld [vmem:[#allocation2 + $0x498] sm:$0xff] }
 0x15f   :  { %2054 = vmatprep.subr.bf16.mxu1 %v2930_v54  ;;  %v2986_v54 = vcombine.high %v307_v49, %v311_v50  ;;  %v359_v42 = vld [vmem:[#allocation2 + $0x4b8] sm:$0xff] }
 0x161   :  { %1969 = vmatpush1.bf16.msra.mxu0 %v2927_v62  ;;  %v2983_v62 = vcombine.low %v306_v47, %v310_v48  ;;  %v362_v47 = vld [vmem:[#allocation2 + $0x4d0] sm:$0xff] }
 0x162   :  { %2055 = vmatpush1.bf16.msra.mxu1 %v2929_v63  ;;  %1970 = vmatprep.subr.bf16.mxu0 %v2936_v0  ;;  %v2985_v63 = vcombine.low %v307_v49, %v311_v50  ;;  %v2992_v0 = vcombine.high %v314_v55, %v318_v56  ;;  %v366_v48 = vld [vmem:[#allocation2 + $0x4f0] sm:$0xff]  ;;  %v363_v49 = vld [vmem:[#allocation2 + $0x4d8] sm:$0xff] }
 0x163   :  { %2056 = vmatprep.subr.bf16.mxu1 %v2938_v2  ;;  %v2994_v2 = vcombine.high %v315_v57, %v319_v59  ;;  %v367_v50 = vld [vmem:[#allocation2 + $0x4f8] sm:$0xff] }
 0x165   :  { %1971 = vmatpush1.bf16.msra.mxu0 %v2935_v7  ;;  %v2991_v7 = vcombine.low %v314_v55, %v318_v56  ;;  %v374_v55 = vld [vmem:[#allocation2 + $0x530] sm:$0xff]  ;;  %v371_v56 = vld [vmem:[#allocation2 + $0x518] sm:$0xff] }
 0x166   :  { %2057 = vmatpush1.bf16.msra.mxu1 %v2937_v8  ;;  %1972 = vmatprep.subr.bf16.mxu0 %v2944_v9  ;;  %v2993_v8 = vcombine.low %v315_v57, %v319_v59  ;;  %v3000_v9 = vcombine.high %v322_v3, %v326_v4  ;;  %v375_v57 = vld [vmem:[#allocation2 + $0x538] sm:$0xff]  ;;  %v3041_v59 = vcombine.low %v363_v49, %v367_v50 }
 0x167   :  { %2058 = vmatprep.subr.bf16.mxu1 %v2946_v10  ;;  %v3002_v10 = vcombine.high %v323_v5, %v327_v6 }
 0x169   :  { %1973 = vmatpush1.bf16.msra.mxu0 %v2943_v15  ;;  %v2999_v15 = vcombine.low %v322_v3, %v326_v4  ;;  %v379_v3 = vld [vmem:[#allocation2 + $0x558] sm:$0xff] }
 0x16a   :  { %2059 = vmatpush1.bf16.msra.mxu1 %v2945_v16  ;;  %1974 = vmatprep.subr.bf16.mxu0 %v2952_v17  ;;  %v3001_v16 = vcombine.low %v323_v5, %v327_v6  ;;  %v3008_v17 = vcombine.high %v330_v11, %v334_v12  ;;  %v383_v4 = vld [vmem:[#allocation2 + $0x578] sm:$0xff]  ;;  %v3049_v6 = vcombine.low %v371_v56, %v375_v57 }
 0x16b   :  { %2060 = vmatprep.subr.bf16.mxu1 %v2954_v18  ;;  %v3010_v18 = vcombine.high %v331_v13, %v335_v14 }
 0x16d   :  { %1975 = vmatpush1.bf16.msra.mxu0 %v2951_v28  ;;  %v3007_v28 = vcombine.low %v330_v11, %v334_v12  ;;  %v387_v11 = vld [vmem:[#allocation2 + $0x598] sm:$0xff] }
 0x16e   :  { %2061 = vmatpush1.bf16.msra.mxu1 %v2953_v29  ;;  %1976 = vmatprep.subr.bf16.mxu0 %v2960_v30  ;;  %v3009_v29 = vcombine.low %v331_v13, %v335_v14  ;;  %v3016_v30 = vcombine.high %v338_v19, %v342_v20  ;;  %v391_v12 = vld [vmem:[#allocation2 + $0x5b8] sm:$0xff]  ;;  %v3057_v14 = vcombine.low %v379_v3, %v383_v4 }
 0x16f   :  { %2062 = vmatprep.subr.bf16.mxu1 %v2962_v31  ;;  %v3018_v31 = vcombine.high %v339_v23, %v343_v27  ;;  %v395_v19 = vld [vmem:[#allocation2 + $0x5d8] sm:$0xff] }
 0x170   :  { %v399_v20 = vld [vmem:[#allocation2 + $0x5f8] sm:$0xff] }
 0x171   :  { %1977 = vmatpush1.bf16.msra.mxu0 %v2959_v36  ;;  %v351_v36 = vld [vmem:[#allocation2 + $0x478] sm:$0xff] }
 0x172   :  { %2063 = vmatpush1.bf16.msra.mxu1 %v2961_v37  ;;  %1978 = vmatprep.subr.bf16.mxu0 %v2968_v38  ;;  %v3017_v37 = vcombine.low %v339_v23, %v343_v27  ;;  %v3024_v38 = vcombine.high %v346_v32, %v350_v33  ;;  %v3026_v41 = vcombine.high %v347_v35, %v351_v36 }
 0x173   :  { %2064 = vmatprep.subr.bf16.mxu1 %v2970_v39  ;;  %v354_v39 = vld [vmem:[#allocation2 + $0x490] sm:$0xff]  ;;  %v3065_v27 = vcombine.low %v387_v11, %v391_v12 }
 0x175   :  { %1979 = vmatpush1.bf16.msra.mxu0 %v2967_v43  ;;  %v3023_v43 = vcombine.low %v346_v32, %v350_v33  ;;  %v403_v32 = vld [vmem:[#allocation2 + $0x618] sm:$0xff] }
 0x176   :  { %2065 = vmatpush1.bf16.msra.mxu1 %v2969_v44  ;;  %1980 = vmatprep.subr.bf16.mxu0 %v2976_v45  ;;  %v3025_v44 = vcombine.low %v347_v35, %v351_v36  ;;  %v3032_v45 = vcombine.high %v354_v39, %v358_v40  ;;  %v407_v33 = vld [vmem:[#allocation2 + $0x638] sm:$0xff]  ;;  %v3073_v35 = vcombine.low %v395_v19, %v399_v20 }
 0x177   :  { %2066 = vmatprep.subr.bf16.mxu1 %v2978_v46  ;;  %v3034_v46 = vcombine.high %v355_v60, %v359_v42 }
 0x179   :  { %1981 = vmatpush1.bf16.msra.mxu0 %v2975_v51  ;;  %v3031_v51 = vcombine.low %v354_v39, %v358_v40  ;;  %v414_v39 = vld [vmem:[#allocation2 + $0x670] sm:$0xff]  ;;  %v411_v40 = vld [vmem:[#allocation2 + $0x658] sm:$0xff] }
 0x17a   :  { %2067 = vmatpush1.bf16.msra.mxu1 %v2977_v52  ;;  %1982 = vmatprep.subr.bf16.mxu0 %v2984_v53  ;;  %v3040_v52 = vcombine.high %v362_v47, %v366_v48  ;;  %v3042_v53 = vcombine.high %v363_v49, %v367_v50 }
 0x17b   :  { %2068 = vmatprep.subr.bf16.mxu1 %v2986_v54  ;;  %v370_v54 = vld [vmem:[#allocation2 + $0x510] sm:$0xff] }
 0x17c   :  { %v3047_v5 = vcombine.low %v370_v54, %v374_v55 }
 0x17d   :  { %1983 = vmatpush1.bf16.msra.mxu0 %v2983_v62  ;;  %v3048_v62 = vcombine.high %v370_v54, %v374_v55  ;;  %v427_v54 = vld [vmem:[#allocation2 + $0x6d8] sm:$0xff] }
 0x17e   :  { %2069 = vmatpush1.bf16.msra.mxu1 %v2985_v63  ;;  %1984 = vmatprep.subr.bf16.mxu0 %v2992_v0  ;;  %v3050_v63 = vcombine.high %v371_v56, %v375_v57  ;;  %v378_v0 = vld [vmem:[#allocation2 + $0x550] sm:$0xff]  ;;  %v431_v55 = vld [vmem:[#allocation2 + $0x6f8] sm:$0xff] }
 0x17f   :  { %2070 = vmatprep.subr.bf16.mxu1 %v2994_v2  ;;  %v382_v2 = vld [vmem:[#allocation2 + $0x570] sm:$0xff] }
 0x180   :  { %v3055_v13 = vcombine.low %v378_v0, %v382_v2 }
 0x181   :  { %1985 = vmatpush1.bf16.msra.mxu0 %v2991_v7  ;;  %v3056_v7 = vcombine.high %v378_v0, %v382_v2  ;;  %v435_v0 = vld [vmem:[#allocation2 + $0x718] sm:$0xff] }
 0x182   :  { %2071 = vmatpush1.bf16.msra.mxu1 %v2993_v8  ;;  %1986 = vmatprep.subr.bf16.mxu0 %v3000_v9  ;;  %v3058_v8 = vcombine.high %v379_v3, %v383_v4  ;;  %v386_v9 = vld [vmem:[#allocation2 + $0x590] sm:$0xff]  ;;  %v439_v2 = vld [vmem:[#allocation2 + $0x738] sm:$0xff]  ;;  %v3105_v4 = vcombine.low %v427_v54, %v431_v55 }
 0x183   :  { %2072 = vmatprep.subr.bf16.mxu1 %v3002_v10  ;;  %v390_v10 = vld [vmem:[#allocation2 + $0x5b0] sm:$0xff] }
 0x184   :  { %v3063_v23 = vcombine.low %v386_v9, %v390_v10 }
 0x185   :  { %1987 = vmatpush1.bf16.msra.mxu0 %v2999_v15  ;;  %v3064_v15 = vcombine.high %v386_v9, %v390_v10  ;;  %v443_v9 = vld [vmem:[#allocation2 + $0x758] sm:$0xff] }
 0x186   :  { %2073 = vmatpush1.bf16.msra.mxu1 %v3001_v16  ;;  %1988 = vmatprep.subr.bf16.mxu0 %v3008_v17  ;;  %v3066_v16 = vcombine.high %v387_v11, %v391_v12  ;;  %v394_v17 = vld [vmem:[#allocation2 + $0x5d0] sm:$0xff]  ;;  %v447_v10 = vld [vmem:[#allocation2 + $0x778] sm:$0xff]  ;;  %v3113_v12 = vcombine.low %v435_v0, %v439_v2 }
 0x187   :  { %2074 = vmatprep.subr.bf16.mxu1 %v3010_v18  ;;  %v398_v18 = vld [vmem:[#allocation2 + $0x5f0] sm:$0xff] }
 0x189   :  { %1989 = vmatpush1.bf16.msra.mxu0 %v3007_v28  ;;  %v3072_v28 = vcombine.high %v394_v17, %v398_v18 }
 0x18a   :  { %2075 = vmatpush1.bf16.msra.mxu1 %v3009_v29  ;;  %2001 = vmatprep.subr.bf16.mxu0 %v3016_v30  ;;  %v3074_v29 = vcombine.high %v395_v19, %v399_v20  ;;  %v402_v30 = vld [vmem:[#allocation2 + $0x610] sm:$0xff]  ;;  %v3121_v20 = vcombine.low %v443_v9, %v447_v10 }
 0x18b   :  { %2087 = vmatprep.subr.bf16.mxu1 %v3018_v31  ;;  %v406_v31 = vld [vmem:[#allocation2 + $0x630] sm:$0xff] }
 0x18c   :  { %1991 = vmatmul.mubr.bf16.vlgmr.msra.gmra.mrb[8].mxu0 %v3601_v58  ;;  %v3080_v36 = vcombine.high %v402_v30, %v406_v31 }
 0x18d   :  { %2077 = vmatmul.mubr.bf16.vlgmr.msra.gmra.mrb[8].mxu1 %v3601_v58  ;;  %2002 = vmatpush1.bf16.msra.mxu0 %v3015_v34  ;;  %v3033_v58 = vcombine.low %v355_v60, %v359_v42  ;;  %v3071_v34 = vcombine.low %v394_v17, %v398_v18  ;;  %v3079_v60 = vcombine.low %v402_v30, %v406_v31  ;;  %v451_v17 = vld [vmem:[#allocation2 + $0x798] sm:$0xff] }
 0x18e   :  { %2033 = vmatprep.mubr.bf16.mxu0 %v3607_v1  ;;  %2088 = vmatpush1.bf16.msra.mxu1 %v3017_v37  ;;  %v3082_v37 = vcombine.high %v403_v32, %v407_v33  ;;  %v3081_v42 = vcombine.low %v403_v32, %v407_v33  ;;  %v455_v18 = vld [vmem:[#allocation2 + $0x7b8] sm:$0xff] }
 0x18f   :  { %2119 = vmatprep.mubr.bf16.mxu1 %v3607_v1  ;;  %2003 = vmatprep.subr.bf16.mxu0 %v3024_v38  ;;  %v3039_v1 = vcombine.low %v362_v47, %v366_v48  ;;  %v410_v38 = vld [vmem:[#allocation2 + $0x650] sm:$0xff]  ;;  %v419_v47 = vld [vmem:[#allocation2 + $0x698] sm:$0xff]  ;;  %v3129_v33 = vcombine.low %v451_v17, %v455_v18 }
 0x190   :  { %2089 = vmatprep.subr.bf16.mxu1 %v3026_v41  ;;  %v415_v41 = vld [vmem:[#allocation2 + $0x678] sm:$0xff]  ;;  %v3087_v49 = vcombine.low %v410_v38, %v414_v39 }
 0x191   :  { %2004 = vmatpush1.bf16.msra.mxu0 %v3023_v43  ;;  %v3088_v43 = vcombine.high %v410_v38, %v414_v39  ;;  %v423_v48 = vld [vmem:[#allocation2 + $0x6b8] sm:$0xff]  ;;  %v3089_v50 = vcombine.low %v411_v40, %v415_v41  ;;  %v3338_v38 = vld [vmem:[#allocation5 + $0x40] sm:$0xff]  }
 0x192   :  { %2090 = vmatpush1.bf16.msra.mxu1 %v3025_v44  ;;  %2005 = vmatprep.subr.bf16.mxu0 %v3032_v45  ;;  %v3090_v44 = vcombine.high %v411_v40, %v415_v41  ;;  %v418_v45 = vld [vmem:[#allocation2 + $0x690] sm:$0xff]  ;;  %v3097_v57 = vcombine.low %v419_v47, %v423_v48  ;;  %v459_v30 = vld [vmem:[#allocation2 + $0x7d8] sm:$0xff]  ;;  %v3339_v39 = vld [vmem:[#allocation5 + $0xc0] sm:$0xff]  }
 0x193   :  { %2091 = vmatprep.subr.bf16.mxu1 %v3034_v46  ;;  %v422_v46 = vld [vmem:[#allocation2 + $0x6b0] sm:$0xff]  ;;  %v463_v31 = vld [vmem:[#allocation2 + $0x7f8] sm:$0xff]  ;;  %v3340_v40 = vld [vmem:[#allocation5] sm:$0xff]  }
 0x194   :  { %v3095_v56 = vcombine.low %v418_v45, %v422_v46  ;;  %v3341_v41 = vld [vmem:[#allocation5 + $0x80] sm:$0xff]  }
 0x195   :  { %2006 = vmatpush1.bf16.msra.mxu0 %v3031_v51  ;;  %v3096_v51 = vcombine.high %v418_v45, %v422_v46  ;;  %v3346_v45 = vld [vmem:[#allocation5 + $0x50] sm:$0xff]  }
 0x196   :  { %2092 = vmatpush1.bf16.msra.mxu1 %v3033_v58  ;;  %2007 = vmatprep.subr.bf16.mxu0 %v3040_v52  ;;  %v3098_v58 = vcombine.high %v419_v47, %v423_v48  ;;  %v426_v52 = vld [vmem:[#allocation2 + $0x6d0] sm:$0xff] }
 0x197   :  { %2093 = vmatprep.subr.bf16.mxu1 %v3042_v53  ;;  %v430_v53 = vld [vmem:[#allocation2 + $0x6f0] sm:$0xff] }
 0x198   :  { %v3103_v3 = vcombine.low %v426_v52, %v430_v53  ;;  %v3347_v46 = vld [vmem:[#allocation5 + $0xd0] sm:$0xff]  }
 0x199   :  { %2008 = vmatpush1.bf16.msra.mxu0 %v3039_v1  ;;  %v3104_v1 = vcombine.high %v426_v52, %v430_v53  ;;  %v3348_v47 = vld [vmem:[#allocation5 + $0x10] sm:$0xff]   ;;  %v3355_v52 = vld [vmem:[#allocation5 + $0xe0] sm:$0xff]  }
 0x19a   :  { %2094 = vmatpush1.bf16.msra.mxu1 %v3041_v59  ;;  %2009 = vmatprep.subr.bf16.mxu0 %v3048_v62  ;;  %v3106_v59 = vcombine.high %v427_v54, %v431_v55  ;;  %v434_v62 = vld [vmem:[#allocation2 + $0x710] sm:$0xff]  ;;  %v3356_v53 = vld [vmem:[#allocation5 + $0x20] sm:$0xff]   ;;  %v3358_v55 = vld [vmem:[#allocation5 + $0x68] sm:$0xff]  }
 0x19b   :  { %2095 = vmatprep.subr.bf16.mxu1 %v3050_v63  ;;  %v438_v63 = vld [vmem:[#allocation2 + $0x730] sm:$0xff]  ;;  %v3357_v54 = vld [vmem:[#allocation5 + $0xa0] sm:$0xff]  }
 0x19c   :  { %v3111_v11 = vcombine.low %v434_v62, %v438_v63  ;;  %v3349_v48 = vld [vmem:[#allocation5 + $0x90] sm:$0xff]  }
 0x19d   :  { %2010 = vmatpush1.bf16.msra.mxu0 %v3047_v5  ;;  %v3112_v5 = vcombine.high %v434_v62, %v438_v63  ;;  %v3363_v62 = vld [vmem:[#allocation5 + $0xf0] sm:$0xff]  }
 0x19e   :  { %2096 = vmatpush1.bf16.msra.mxu1 %v3049_v6  ;;  %2011 = vmatprep.subr.bf16.mxu0 %v3056_v7  ;;  %v3114_v6 = vcombine.high %v435_v0, %v439_v2  ;;  %v442_v7 = vld [vmem:[#allocation2 + $0x750] sm:$0xff]  ;;  %v3366_v2 = vld [vmem:[#allocation5 + $0x78] sm:$0xff]  }
 0x19f   :  { %2097 = vmatprep.subr.bf16.mxu1 %v3058_v8  ;;  %v446_v8 = vld [vmem:[#allocation2 + $0x770] sm:$0xff] }
 0x1a0   :  { %v3119_v19 = vcombine.low %v442_v7, %v446_v8  ;;  %v3364_v63 = vld [vmem:[#allocation5 + $0x30] sm:$0xff]  }
 0x1a1   :  { %2012 = vmatpush1.bf16.msra.mxu0 %v3055_v13  ;;  %v3120_v13 = vcombine.high %v442_v7, %v446_v8  ;;  %v3365_v0 = vld [vmem:[#allocation5 + $0xb0] sm:$0xff]   ;;  %v3371_v7 = vld [vmem:[#allocation5 + $0x1c0] sm:$0xff]  }
 0x1a2   :  { %2098 = vmatpush1.bf16.msra.mxu1 %v3057_v14  ;;  %2013 = vmatprep.subr.bf16.mxu0 %v3064_v15  ;;  %v3122_v14 = vcombine.high %v443_v9, %v447_v10  ;;  %v450_v15 = vld [vmem:[#allocation2 + $0x790] sm:$0xff] }
 0x1a3   :  { %2099 = vmatprep.subr.bf16.mxu1 %v3066_v16  ;;  %v454_v16 = vld [vmem:[#allocation2 + $0x7b0] sm:$0xff] }
 0x1a4   :  { %v3127_v32 = vcombine.low %v450_v15, %v454_v16  ;;  %v3628_v8 = vld [vmem:[%s3669_s4] sm:$0xff] }
 0x1a5   :  { %2014 = vmatpush1.bf16.msra.mxu0 %v3063_v23  ;;  %v3128_v23 = vcombine.high %v450_v15, %v454_v16  ;;  %v469_v9 = vrot.slane %v3628_v8, %v65_v22  ;;  %v477_v10 = vrot.slane %v3628_v8, %v73_v25 }
 0x1a6   :  { %2100 = vmatpush1.bf16.msra.mxu1 %v3065_v27  ;;  %2015 = vmatprep.subr.bf16.mxu0 %v3072_v28  ;;  %v3130_v27 = vcombine.high %v451_v17, %v455_v18  ;;  %v458_v28 = vld [vmem:[#allocation2 + $0x7d0] sm:$0xff] }
 0x1a7   :  { %2101 = vmatprep.subr.bf16.mxu1 %v3074_v29  ;;  %v462_v29 = vld [vmem:[#allocation2 + $0x7f0] sm:$0xff] }
 0x1a9   :  { %2016 = vmatpush1.bf16.msra.mxu0 %v3071_v34  ;;  %v3136_v34 = vcombine.high %v458_v28, %v462_v29 }
 0x1aa   :  { %2102 = vmatpush1.bf16.msra.mxu1 %v3073_v35  ;;  %2017 = vmatprep.subr.bf16.mxu0 %v3080_v36  ;;  %v3138_v35 = vcombine.high %v459_v30, %v463_v31  ;;  %v3135_v36 = vcombine.low %v458_v28, %v462_v29 }
 0x1ab   :  { %2103 = vmatprep.subr.bf16.mxu1 %v3082_v37  ;;  %v3137_v37 = vcombine.low %v459_v30, %v463_v31 }
 0x1ad   :  { %2018 = vmatpush1.bf16.msra.mxu0 %v3079_v60  ;;  %v3342_v60 = vld [vmem:[#allocation5 + $0x48] sm:$0xff]  }
 0x1ae   :  { %2104 = vmatpush1.bf16.msra.mxu1 %v3081_v42  ;;  %2019 = vmatprep.subr.bf16.mxu0 %v3088_v43  ;;  %v3343_v42 = vld [vmem:[#allocation5 + $0xc8] sm:$0xff]  }
 0x1af   :  { %2105 = vmatprep.subr.bf16.mxu1 %v3090_v44  ;;  %v3344_v43 = vld [vmem:[#allocation5 + $0x8] sm:$0xff]  }
 0x1b0   :  { %v3345_v44 = vld [vmem:[#allocation5 + $0x88] sm:$0xff]  }
 0x1b1   :  { %2020 = vmatpush1.bf16.msra.mxu0 %v3087_v49  ;;  %v3350_v49 = vld [vmem:[#allocation5 + $0x58] sm:$0xff]  }
 0x1b2   :  { %2106 = vmatpush1.bf16.msra.mxu1 %v3089_v50  ;;  %2021 = vmatprep.subr.bf16.mxu0 %v3096_v51  ;;  %v3351_v50 = vld [vmem:[#allocation5 + $0xd8] sm:$0xff]  }
 0x1b3   :  { %2107 = vmatprep.subr.bf16.mxu1 %v3098_v58  ;;  %v3352_v51 = vld [vmem:[#allocation5 + $0x18] sm:$0xff]   ;;  %v3354_v58 = vld [vmem:[#allocation5 + $0x60] sm:$0xff]  }
 0x1b5   :  { %2022 = vmatpush1.bf16.msra.mxu0 %v3095_v56  ;;  %v3359_v56 = vld [vmem:[#allocation5 + $0xe8] sm:$0xff]  }
 0x1b6   :  { %2108 = vmatpush1.bf16.msra.mxu1 %v3097_v57  ;;  %2023 = vmatprep.subr.bf16.mxu0 %v3104_v1  ;;  %v3360_v57 = vld [vmem:[#allocation5 + $0x28] sm:$0xff]  }
 0x1b7   :  { %2109 = vmatprep.subr.bf16.mxu1 %v3106_v59  ;;  %v3361_v1 = vld [vmem:[#allocation5 + $0xa8] sm:$0xff]   ;;  %v3362_v59 = vld [vmem:[#allocation5 + $0x70] sm:$0xff]  }
 0x1b9   :  { %2024 = vmatpush1.bf16.msra.mxu0 %v3103_v3  ;;  %v3367_v3 = vld [vmem:[#allocation5 + $0xf8] sm:$0xff]  }
 0x1ba   :  { %2110 = vmatpush1.bf16.msra.mxu1 %v3105_v4  ;;  %2025 = vmatprep.subr.bf16.mxu0 %v3112_v5  ;;  %v3368_v4 = vld [vmem:[#allocation5 + $0x38] sm:$0xff]  }
 0x1bb   :  { %2111 = vmatprep.subr.bf16.mxu1 %v3114_v6  ;;  %v3369_v5 = vld [vmem:[#allocation5 + $0xb8] sm:$0xff]   ;;  %v3370_v6 = vld [vmem:[#allocation5 + $0x140] sm:$0xff]  }
 0x1bd   :  { %2026 = vmatpush1.bf16.msra.mxu0 %v3111_v11  ;;  %v473_v11 = vrot.slane %v3628_v8, %v69_v24 }
 0x1be   :  { %2112 = vmatpush1.bf16.msra.mxu1 %v3113_v12  ;;  %2027 = vmatprep.subr.bf16.mxu0 %v3120_v13  ;;  %v481_v12 = vrot.slane %v3628_v8, %v77_v26 }
 0x1bf   :  { %2113 = vmatprep.subr.bf16.mxu1 %v3122_v14 }
 0x1c1   :  { %2028 = vmatpush1.bf16.msra.mxu0 %v3119_v19 }
 0x1c2   :  { %2114 = vmatpush1.bf16.msra.mxu1 %v3121_v20  ;;  %2029 = vmatprep.subr.bf16.mxu0 %v3128_v23 }
 0x1c3   :  { %2115 = vmatprep.subr.bf16.mxu1 %v3130_v27 }
 0x1c5   :  { %2030 = vmatpush1.bf16.msra.mxu0 %v3127_v32 }
 0x1c6   :  { %2116 = vmatpush1.bf16.msra.mxu1 %v3129_v33  ;;  %2031 = vmatprep.subr.bf16.mxu0 %v3136_v34 }
 0x1c7   :  { %2117 = vmatprep.subr.bf16.mxu1 %v3138_v35 }
 0x1c9   :  { %2032 = vmatpush1.bf16.msra.mxu0 %v3135_v36 }
 0x1ca   :  { %2118 = vmatpush1.bf16.msra.mxu1 %v3137_v37  ;;  %3204 = vmatprep.subr.bf16.mxu0 %v3338_v38 }
 0x1cb   :  { %3226 = vmatprep.subr.bf16.mxu1 %v3339_v39 }
 0x1cc   :  { %2034 = vmatmul.mubr.bf16.vlgmr.msra.gmra.mrb[8].mxu0 %v3605_v61 }
 0x1cd   :  { %2120 = vmatmul.mubr.bf16.vlgmr.msra.gmra.mrb[8].mxu1 %v3605_v61  ;;  %3205 = vmatpush3.bf16.msra.mxu0 %v3340_v40  ;;  %v3353_v61 = vld [vmem:[#allocation5 + $0x98] sm:$0xff]  }
 0x1ce   :  { %3227 = vmatpush3.bf16.msra.mxu1 %v3341_v41  ;;  %3206 = vmatprep.subr.bf16.mxu0 %v3342_v60  ;;  %v3372_v60 = vld [vmem:[#allocation5 + $0x100] sm:$0xff]  }
 0x1cf   :  { %3228 = vmatprep.subr.bf16.mxu1 %v3343_v42  ;;  %v3373_v42 = vld [vmem:[#allocation5 + $0x180] sm:$0xff]  }
 0x1d1   :  { %3207 = vmatpush3.bf16.msra.mxu0 %v3344_v43  ;;  %v3374_v43 = vld [vmem:[#allocation5 + $0x148] sm:$0xff]  }
 0x1d2   :  { %3229 = vmatpush3.bf16.msra.mxu1 %v3345_v44  ;;  %3208 = vmatprep.subr.bf16.mxu0 %v3346_v45  ;;  %v3375_v44 = vld [vmem:[#allocation5 + $0x1c8] sm:$0xff]  }
 0x1d3   :  { %3230 = vmatprep.subr.bf16.mxu1 %v3347_v46  ;;  %v3376_v45 = vld [vmem:[#allocation5 + $0x108] sm:$0xff]  }
 0x1d4   :  { %v3377_v46 = vld [vmem:[#allocation5 + $0x188] sm:$0xff]  }
 0x1d5   :  { %3209 = vmatpush3.bf16.msra.mxu0 %v3348_v47  ;;  %v3378_v47 = vld [vmem:[#allocation5 + $0x150] sm:$0xff]  }
 0x1d6   :  { %3231 = vmatpush3.bf16.msra.mxu1 %v3349_v48  ;;  %3210 = vmatprep.subr.bf16.mxu0 %v3350_v49  ;;  %v3379_v48 = vld [vmem:[#allocation5 + $0x1d0] sm:$0xff]  }
 0x1d7   :  { %3232 = vmatprep.subr.bf16.mxu1 %v3351_v50  ;;  %v3380_v49 = vld [vmem:[#allocation5 + $0x110] sm:$0xff]  }
 0x1d8   :  { %v3381_v50 = vld [vmem:[#allocation5 + $0x190] sm:$0xff]  }
 0x1d9   :  { %3211 = vmatpush3.bf16.msra.mxu0 %v3352_v51  ;;  %v3382_v51 = vld [vmem:[#allocation5 + $0x158] sm:$0xff]  }
 0x1da   :  { %3233 = vmatpush3.bf16.msra.mxu1 %v3353_v61  ;;  %3212 = vmatprep.subr.bf16.mxu0 %v3354_v58  ;;  %v3383_v61 = vld [vmem:[#allocation5 + $0x1d8] sm:$0xff]  }
 0x1db   :  { %3234 = vmatprep.subr.bf16.mxu1 %v3355_v52  ;;  %v3384_v58 = vld [vmem:[#allocation5 + $0x118] sm:$0xff]  }
 0x1dc   :  { %v3385_v52 = vld [vmem:[#allocation5 + $0x198] sm:$0xff]  }
 0x1dd   :  { %3213 = vmatpush3.bf16.msra.mxu0 %v3356_v53  ;;  %v3386_v53 = vld [vmem:[#allocation5 + $0x160] sm:$0xff]  }
 0x1de   :  { %3235 = vmatpush3.bf16.msra.mxu1 %v3357_v54  ;;  %3214 = vmatprep.subr.bf16.mxu0 %v3358_v55  ;;  %v3387_v54 = vld [vmem:[#allocation5 + $0x1e0] sm:$0xff]  }
 0x1df   :  { %3236 = vmatprep.subr.bf16.mxu1 %v3359_v56  ;;  %v3388_v55 = vld [vmem:[#allocation5 + $0x120] sm:$0xff]  }
 0x1e0   :  { %v3389_v56 = vld [vmem:[#allocation5 + $0x1a0] sm:$0xff]  }
 0x1e1   :  { %3215 = vmatpush3.bf16.msra.mxu0 %v3360_v57  ;;  %v3390_v57 = vld [vmem:[#allocation5 + $0x168] sm:$0xff]  }
 0x1e2   :  { %3237 = vmatpush3.bf16.msra.mxu1 %v3361_v1  ;;  %3216 = vmatprep.subr.bf16.mxu0 %v3362_v59  ;;  %v3391_v1 = vld [vmem:[#allocation5 + $0x1e8] sm:$0xff]  }
 0x1e3   :  { %3238 = vmatprep.subr.bf16.mxu1 %v3363_v62  ;;  %v3392_v59 = vld [vmem:[#allocation5 + $0x128] sm:$0xff]  }
 0x1e4   :  { %v3393_v62 = vld [vmem:[#allocation5 + $0x1a8] sm:$0xff]  }
 0x1e5   :  { %3217 = vmatpush3.bf16.msra.mxu0 %v3364_v63  ;;  %v3394_v63 = vld [vmem:[#allocation5 + $0x170] sm:$0xff]  }
 0x1e6   :  { %3239 = vmatpush3.bf16.msra.mxu1 %v3365_v0  ;;  %3218 = vmatprep.subr.bf16.mxu0 %v3366_v2  ;;  %v3395_v0 = vld [vmem:[#allocation5 + $0x1f0] sm:$0xff]  }
 0x1e7   :  { %3240 = vmatprep.subr.bf16.mxu1 %v3367_v3  ;;  %v3396_v2 = vld [vmem:[#allocation5 + $0x130] sm:$0xff]  }
 0x1e8   :  { %v3397_v3 = vld [vmem:[#allocation5 + $0x1b0] sm:$0xff]  }
 0x1e9   :  { %3219 = vmatpush3.bf16.msra.mxu0 %v3368_v4  ;;  %v3398_v4 = vld [vmem:[#allocation5 + $0x178] sm:$0xff]  }
 0x1ea   :  { %3241 = vmatpush3.bf16.msra.mxu1 %v3369_v5  ;;  %3248 = vmatprep.subr.bf16.mxu0 %v3370_v6  ;;  %v3399_v5 = vld [vmem:[#allocation5 + $0x1f8] sm:$0xff]  }
 0x1eb   :  { %3270 = vmatprep.subr.bf16.mxu1 %v3371_v7  ;;  %v3400_v6 = vld [vmem:[#allocation5 + $0x138] sm:$0xff]  }
 0x1ec   :  { %v3401_v7 = vld [vmem:[#allocation5 + $0x1b8] sm:$0xff]  }
 0x21f   :  { %v1863_v13 = vpop.f32.mrb[4].mxu0  ;;  %v1949_v14 = vpop.f32.mrb[4].mxu1 }
 0x220   :  { %v3292_v15 = vadd.f32 %v1863_v13, %v469_v9  ;;  %v3296_v16 = vadd.f32 %v1949_v14, %v477_v10  ;;  %v1865_v17 = vpop.f32.mrb[5].mxu0  ;;  %v1951_v18 = vpop.f32.mrb[5].mxu1 }
 0x221   :  { %v3293_v19 = vadd.f32 %v1865_v17, %v473_v11  ;;  %v3297_v22 = vadd.f32 %v1951_v18, %v481_v12  ;;  %v1867_v20 = vpop.f32.mrb[6].mxu0  ;;  %v1953_v23 = vpop.f32.mrb[6].mxu1 }
 0x222   :  { %v3294_v27 = vadd.f32 %v1867_v20, %v469_v9  ;;  %v3298_v25 = vadd.f32 %v1953_v23, %v477_v10  ;;  %v1869_v28 = vpop.f32.mrb[7].mxu0  ;;  %v1955_v29 = vpop.f32.mrb[7].mxu1  ;;  %v2130_v31 = vmax.f32 %v3292_v15, 0.0  ;;  %v2132_v32 = vmax.f32 %v3296_v16, 0.0 }
 0x223   :  { %v3295_v30 = vadd.f32 %v1869_v28, %v473_v11  ;;  %v3299_v24 = vadd.f32 %v1955_v29, %v481_v12  ;;  %v2131_v34 = vmax.f32 %v3293_v19, 0.0  ;;  %v2133_v35 = vmax.f32 %v3297_v22, 0.0 }
 0x224   :  { %v2138_v33 = vmax.f32 %v3294_v27, 0.0  ;;  %v2140_v26 = vmax.f32 %v3298_v25, 0.0  ;;  %v484_v9 = vsub.s32 4, %v3584_v21  ;;  %v492_v10 = vsub.s32 6, %v3584_v21 }
 0x225   :  { %v2139_v36 = vmax.f32 %v3295_v30, 0.0  ;;  %v2141_v37 = vmax.f32 %v3299_v24, 0.0  ;;  %v488_v11 = vsub.s32 5, %v3584_v21  ;;  %v496_v12 = vsub.s32 7, %v3584_v21 }
 0x226   :  { %v2146_v38 = vpack.c.bf16 %v2138_v33, %v2130_v31  ;;  %v2148_v39 = vpack.c.bf16 %v2140_v26, %v2132_v32  ;;  %v485_v13 = vrot.slane %v3628_v8, %v484_v9  ;;  %v493_v14 = vrot.slane %v3628_v8, %v492_v10 }
 0x227   :  { %v2147_v40 = vpack.c.bf16 %v2139_v36, %v2131_v34  ;;  %v2149_v41 = vpack.c.bf16 %v2141_v37, %v2133_v35  ;;  %v489_v15 = vrot.slane %v3628_v8, %v488_v11  ;;  %v497_v16 = vrot.slane %v3628_v8, %v496_v12 }
 0x229   :  { %2705 = vmatprep.mubr.bf16.mxu0 %v2147_v40  ;;  %2746 = vmatprep.mubr.bf16.mxu1 %v2149_v41 }
 0x22a   :  { %2706 = vmatmul.mubr.bf16.vlgmr.msra.gmra.mrb[12].mxu0 %v2146_v38  ;;  %2747 = vmatmul.mubr.bf16.vlgmr.msra.gmra.mrb[12].mxu1 %v2148_v39 }
 0x22b   :  { %3249 = vmatpush3.bf16.msra.mxu0 %v3372_v60  ;;  %3271 = vmatpush3.bf16.msra.mxu1 %v3373_v42 }
 0x22c   :  { %3250 = vmatprep.subr.bf16.mxu0 %v3374_v43  ;;  %3272 = vmatprep.subr.bf16.mxu1 %v3375_v44 }
 0x22f   :  { %3251 = vmatpush3.bf16.msra.mxu0 %v3376_v45  ;;  %3273 = vmatpush3.bf16.msra.mxu1 %v3377_v46  ;;  %v3139_v45 = vld [vmem:[%s3671_s6] ss:$0 sm:$0xff]  ;;  %s3489_s6 = smov [#allocation7]  }
 0x230   :  { %3252 = vmatprep.subr.bf16.mxu0 %v3378_v47  ;;  %3274 = vmatprep.subr.bf16.mxu1 %v3379_v48  ;;  %s2862_s14 = sshll.u32 %s3489_s6, 4  ;;  %s2863_s14 = int_to_ptr.vmem [resolvable:$true] %s2862_s14 }
 0x231   :  { %s3454_s15 = scalar_lea.vmem %s2863_s14, 256  ;;  %p3459_p3 = scmp.lt.s32.totalorder %s2863_s14, %s2863_s14 }
 0x232   :  { %p3455_p2 = scmp.ne.s32.totalorder %s2863_s14, %s3454_s15  ;;  %p3460_p4 = scmp.lt.s32.totalorder %s3454_s15, %s3454_s15 }
 0x233   :  { %3253 = vmatpush3.bf16.msra.mxu0 %v3380_v49  ;;  %3275 = vmatpush3.bf16.msra.mxu1 %v3381_v50 }
 0x234   :  { %3254 = vmatprep.subr.bf16.mxu0 %v3382_v51  ;;  %3276 = vmatprep.subr.bf16.mxu1 %v3383_v61  ;;  %p3461_p5 = por %p3460_p4, %p3459_p3 }
 0x236   :  { %p3462_p6 = pnand %p3461_p5, %p3455_p2 }
 0x237   :  { %3255 = vmatpush3.bf16.msra.mxu0 %v3384_v58  ;;  %3277 = vmatpush3.bf16.msra.mxu1 %v3385_v52 }
 0x238   :  { %3256 = vmatprep.subr.bf16.mxu0 %v3386_v53  ;;  %3278 = vmatprep.subr.bf16.mxu1 %v3387_v54 }
 0x23b   :  { %3257 = vmatpush3.bf16.msra.mxu0 %v3388_v55  ;;  %3279 = vmatpush3.bf16.msra.mxu1 %v3389_v56 }
 0x23c   :  { %3258 = vmatprep.subr.bf16.mxu0 %v3390_v57  ;;  %3280 = vmatprep.subr.bf16.mxu1 %v3391_v1 }
 0x23f   :  { %3259 = vmatpush3.bf16.msra.mxu0 %v3392_v59  ;;  %3281 = vmatpush3.bf16.msra.mxu1 %v3393_v62 }
 0x240   :  { %3260 = vmatprep.subr.bf16.mxu0 %v3394_v63  ;;  %3282 = vmatprep.subr.bf16.mxu1 %v3395_v0 }
 0x243   :  { %3261 = vmatpush3.bf16.msra.mxu0 %v3396_v2  ;;  %3283 = vmatpush3.bf16.msra.mxu1 %v3397_v3 }
 0x244   :  { %3262 = vmatprep.subr.bf16.mxu0 %v3398_v4  ;;  %3284 = vmatprep.subr.bf16.mxu1 %v3399_v5 }
 0x247   :  { %3263 = vmatpush3.bf16.msra.mxu0 %v3400_v6  ;;  %3285 = vmatpush3.bf16.msra.mxu1 %v3401_v7 }
 0x29f   :  { %v2035_v17 = vpop.f32.mrb[8].mxu0 }
 0x2a0   :  { %v3300_v18 = vadd.f32 %v2035_v17, %v485_v13  ;;  %v2121_v19 = vpop.f32.mrb[8].mxu1  ;;  %v2037_v22 = vpop.f32.mrb[9].mxu0 }
 0x2a1   :  { %v3304_v20 = vadd.f32 %v2121_v19, %v493_v14  ;;  %v3301_v23 = vadd.f32 %v2037_v22, %v489_v15  ;;  %v2123_v27 = vpop.f32.mrb[9].mxu1  ;;  %v2039_v25 = vpop.f32.mrb[10].mxu0 }
 0x2a2   :  { %v3305_v28 = vadd.f32 %v2123_v27, %v497_v16  ;;  %v3302_v29 = vadd.f32 %v2039_v25, %v485_v13  ;;  %v2125_v30 = vpop.f32.mrb[10].mxu1  ;;  %v2041_v21 = vpop.f32.mrb[11].mxu0  ;;  %v2134_v33 = vmax.f32 %v3300_v18, 0.0 }
 0x2a3   :  { %v3306_v24 = vadd.f32 %v2125_v30, %v493_v14  ;;  %v3303_v31 = vadd.f32 %v2041_v21, %v489_v15  ;;  %v2127_v32 = vpop.f32.mrb[11].mxu1  ;;  %v2136_v35 = vmax.f32 %v3304_v20, 0.0  ;;  %v2135_v8 = vmax.f32 %v3301_v23, 0.0 }
 0x2a4   :  { %v2142_v26 = vmax.f32 %v3302_v29, 0.0  ;;  %v3307_v34 = vadd.f32 %v2127_v32, %v497_v16  ;;  %v2137_v38 = vmax.f32 %v3305_v28, 0.0 }
 0x2a5   :  { %v2144_v36 = vmax.f32 %v3306_v24, 0.0  ;;  %v2143_v37 = vmax.f32 %v3303_v31, 0.0 }
 0x2a6   :  { %v2150_v39 = vpack.c.bf16 %v2142_v26, %v2134_v33  ;;  %v2145_v40 = vmax.f32 %v3307_v34, 0.0 }
 0x2a7   :  { %v2152_v41 = vpack.c.bf16 %v2144_v36, %v2136_v35  ;;  %v2151_v60 = vpack.c.bf16 %v2143_v37, %v2135_v8 }
 0x2a8   :  { %v2153_v42 = vpack.c.bf16 %v2145_v40, %v2137_v38 }
 0x2a9   :  { %2787 = vmatprep.mubr.bf16.mxu0 %v2151_v60 }
 0x2aa   :  { %2828 = vmatprep.mubr.bf16.mxu1 %v2153_v42  ;;  %2788 = vmatmul.mubr.bf16.vlgmr.msra.gmra.mrb[16].mxu0 %v2150_v39 }
 0x2ab   :  { %2829 = vmatmul.mubr.bf16.vlgmr.msra.gmra.mrb[16].mxu1 %v2152_v41 }
 0x2fd   :  { %v3220_v43 = vpop.f32.mrb[12].mxu0  ;;  %v3242_v44 = vpop.f32.mrb[12].mxu1 }
 0x2fe   :  { %v3221_v46 = vpop.f32.mrb[13].mxu0  ;;  %v3243_v47 = vpop.f32.mrb[13].mxu1 }
 0x2ff   :  { %v3222_v48 = vadd.f32 %v3221_v46, %v3220_v43  ;;  %v3244_v49 = vadd.f32 %v3243_v47, %v3242_v44  ;;  %v3223_v50 = vpop.f32.mrb[14].mxu0  ;;  %v3245_v51 = vpop.f32.mrb[14].mxu1 }
 0x300   :  { %v3224_v61 = vpop.f32.mrb[15].mxu0  ;;  %v3246_v58 = vpop.f32.mrb[15].mxu1 }
 0x301   :  { %v2708_v52 = vadd.f32 %v3222_v48, %v3139_v45  ;;  %v3225_v53 = vadd.f32 %v3224_v61, %v3223_v50  ;;  %v3247_v54 = vadd.f32 %v3246_v58, %v3245_v51 }
 0x303   :  { %v2749_v55 = vadd.f32 %v3244_v49, %v2708_v52  ;;  %v2711_v56 = vadd.f32 %v3225_v53, %v3139_v45 }
 0x305   :  { %v2752_v57 = vadd.f32 %v3247_v54, %v2711_v56 }
 0x37d   :  { %v3264_v1 = vpop.f32.mrb[16].mxu0 }
 0x37e   :  { %v3286_v59 = vpop.f32.mrb[16].mxu1  ;;  %v3265_v62 = vpop.f32.mrb[17].mxu0 }
 0x37f   :  { %v3266_v63 = vadd.f32 %v3265_v62, %v3264_v1  ;;  %v3287_v0 = vpop.f32.mrb[17].mxu1  ;;  %v3267_v2 = vpop.f32.mrb[18].mxu0 }
 0x380   :  { %v3288_v3 = vadd.f32 %v3287_v0, %v3286_v59  ;;  %v3289_v4 = vpop.f32.mrb[18].mxu1  ;;  %v3268_v5 = vpop.f32.mrb[19].mxu0 }
 0x381   :  { %v2790_v6 = vadd.f32 %v3266_v63, %v2749_v55  ;;  %v3269_v7 = vadd.f32 %v3268_v5, %v3267_v2  ;;  %v3290_v9 = vpop.f32.mrb[19].mxu1 }
 0x382   :  { %v3291_v10 = vadd.f32 %v3290_v9, %v3289_v4 }
 0x383   :  { %v2793_v11 = vadd.f32 %v3269_v7, %v2752_v57  ;;  %v2831_v12 = vadd.f32 %v3288_v3, %v2790_v6 }
 0x385   :  { %2837 = vmax.xlane.f32.xlu0 %v2831_v12  ;;  %v2834_v13 = vadd.f32 %v3291_v10, %v2793_v11 }
 0x389   :  { %2839 = vmax.xlane.f32.xlu0 %v2834_v13 }
 0x412   :  { %v2838_v14 = vpop.xlane.xlu0 %2837 }
 0x413   :  { %v2841_v15 = vsub.f32 %v2831_v12, %v2838_v14 }
 0x415   :  { %v2843_v16 = vmul.f32 1.442695, %v2841_v15 }
 0x416   :  { %v2840_v17 = vpop.xlane.xlu0 %2839 }
 0x417   :  { %3402 = vpow2.f32 %v2843_v16  ;;  %v2842_v18 = vsub.f32 %v2834_v13, %v2840_v17 }
 0x419   :  { %v2845_v19 = vmul.f32 1.442695, %v2842_v18 }
 0x41b   :  { %3404 = vpow2.f32 %v2845_v19 }
 0x421   :  { %v3403_v22 = vpop.eup %3402 }
 0x422   :  { %2847 = vadd.xlane.f32.xlu1 %v3403_v22 }
 0x425   :  { %v3405_v20 = vpop.eup %3404 }
 0x426   :  { %2849 = vadd.xlane.f32.xlu1 %v3405_v20 }
 0x4af   :  { %v2848_v23 = vpop.xlane.xlu1 %2847 }
 0x4b0   :  { %3406 = vrcp.f32 %v2848_v23 }
 0x4b3   :  { %v2850_v27 = vpop.xlane.xlu1 %2849 }
 0x4b4   :  { %3408 = vrcp.f32 %v2850_v27 }
 0x4ba   :  { %v3407_v25 = vpop.eup %3406 }
 0x4bb   :  { %v2853_v28 = vmul.f32 %v3407_v25, %v3403_v22 }
 0x4bd   :  { %2855 = vst [vmem:[#allocation7] sm:$0xff] %v2853_v28 }
 0x4be   :  { %v3409_v29 = vpop.eup %3408 }
 0x4bf   :  { %v2854_v30 = vmul.f32 %v3409_v29, %v3405_v20 }
 0x4c1   :  { %2856 = vst [vmem:[#allocation7 + $0x8] sm:$0xff] %v2854_v30 }
 0x4c2   :  { %3465 = shalt.err (!%p3462_p6)
}
 0x4c3   :  { %s3466_s18 = scalar_lea.hbm %s3672_s7, 256 }
 0x4c4   :  { %p3467_p7 = scmp.ne.s32.totalorder %s3672_s7, %s3466_s18  ;;  %p3470_p8 = scmp.lt.u32.totalorder %s3466_s18, %s3672_s7 }
 0x4c6   :  { %p3472_p9 = pnand %p3470_p8, %p3467_p7 }
 0x4c8   :  { %3475 = shalt.err (!%p3472_p9)
}
 0x4c9   :  { %s3490_s23 = smov 128   ;;  %s3491_s24 = smov 8  }
 0x4ca   :  { %2868 = dma.vmem_to_hbm [thread:$0]  %s2863_s14, 256, %s3672_s7, [#allocation4], %s3490_s23, %s3490_s23, %s3491_s24  }
 0x4cb   :  { %3480 = dma.done.wait [#allocation4], 256  }
 0x4cc   :  { %3481 = vsyncadd [#allocation4], 4294967040 }
 0x4cd   :  { %2872 = vsyncpa [#allocation3], 1 }
 0x4ce   :  { %2873 = vsyncpa [#allocation6], 1 }
 0x4cf   :  { %2874 = vsyncpa [#allocation4], 1 }

</bundles_post_ra>
